<compile_context>
chip_gen: v7x
topology: tpu7x:2x2x1
jax: 0.10.0
libtpu: 0.0.40
codegen_flags: <defaults>
</compile_context>

<pallas_src>
import math
import jax
import jax.numpy as jnp
from jax.experimental import pallas as pl
from jax.experimental.pallas import tpu as pltpu

# ----------------------------- config -------------------------------------
VOCAB = 64
TYPE_VOCAB = 2
MAX_POS = 32
HIDDEN = 32
NUM_HEADS = 4
HEAD_DIM = HIDDEN // NUM_HEADS
INTERMEDIATE = 64
NUM_LAYERS = 2
EPS = 1e-12
BATCH = 2
SEQ = 8
BS = BATCH * SEQ

# ------------- packed parameter slab row layout (all blocks at lane 0) ------
R_WORD = 0                                   # (VOCAB, H)  word embedding table
R_POS = R_WORD + VOCAB                       # (BS, H)     pre-gathered pos rows
R_LAYER = R_POS + BS                         # per-layer matrix blocks
LAYER_ROWS = 3 * HIDDEN + INTERMEDIATE       # wqkv(32) + wo(32) + wi(32) + wo2(64)
R_VEC = R_LAYER + NUM_LAYERS * LAYER_ROWS    # vector rows (LN/bias/type)
SLAB_ROWS_RAW = R_VEC + 1 + 4 * NUM_LAYERS
SLAB_ROWS = ((SLAB_ROWS_RAW + 7) // 8) * 8   # pad rows to a multiple of 8


# --------------------------- small helpers ---------------------------------
def _gelu(x):
    # 'gelu_new' (tanh approximation) — config.hidden_act = 'gelu_new'
    return 0.5 * x * (1.0 + jnp.tanh(
        math.sqrt(2.0 / math.pi) * (x + 0.044715 * x * x * x)))


def _layer_norm(x, gamma, beta):
    mean = jnp.mean(x, axis=-1, keepdims=True)
    var = jnp.mean((x - mean) ** 2, axis=-1, keepdims=True)
    return (x - mean) * jax.lax.rsqrt(var + EPS) * gamma + beta


# --------------------- fully fused BERT forward kernel ----------------------
def bert_fused_kernel(w_ref, bias_ref, ids_ref, o_ref):
    H, HD, NH, I = HIDDEN, HEAD_DIM, NUM_HEADS, INTERMEDIATE
    inv_sqrt_d = 1.0 / math.sqrt(HD)

    # ----------------- embeddings (gather-free, in-kernel) ------------------
    ids = ids_ref[...]                                         # (BS, 2) int32
    wid = ids[:, 0:1]                                          # word ids
    tid = ids[:, 1:2]                                          # token type ids
    onehot = jnp.where(
        jax.lax.broadcasted_iota(jnp.int32, (BS, VOCAB), 1) == wid, 1.0, 0.0)
    word = jnp.dot(onehot, w_ref[R_WORD:R_WORD + VOCAB, 0:H],
                   preferred_element_type=jnp.float32)         # (BS, H)
    pos = w_ref[R_POS:R_POS + BS, 0:H]                         # pre-gathered rows
    emb_g = w_ref[R_VEC:R_VEC + 1, 0 * H:1 * H]
    emb_b = w_ref[R_VEC:R_VEC + 1, 1 * H:2 * H]
    typ0 = w_ref[R_VEC:R_VEC + 1, 2 * H:3 * H]
    typ1 = w_ref[R_VEC:R_VEC + 1, 3 * H:4 * H]
    # TODO(synk): TYPE_VOCAB > 2 would use a one-hot matmul like the word lookup.
    typ = jnp.where(tid == 0, typ0, typ1)                      # (BS, H)
    x = _layer_norm(word + pos + typ, emb_g, emb_b)            # (BS, H)

    # Additive attention bias tiled over heads ONCE (hoisted out of layer loop).
    bias_h = jnp.concatenate([bias_ref[...]] * NH, axis=0)     # (NH*BS, BS)

    # TODO(synk): if NUM_LAYERS grows, switch to lax.fori_loop indexing the slab
    # row blocks dynamically to bound live ranges; static unroll is fine at L=2.
    for l in range(NUM_LAYERS):
        base = R_LAYER + l * LAYER_ROWS
        vrow = R_VEC + 1 + 4 * l
        wqkv = w_ref[base + 0 * H:base + 1 * H, 0:3 * H]       # (H, 3H)
        wo   = w_ref[base + 1 * H:base + 2 * H, 0:H]           # (H, H)
        wi   = w_ref[base + 2 * H:base + 3 * H, 0:I]           # (H, I)
        wo2  = w_ref[base + 3 * H:base + 3 * H + I, 0:H]       # (I, H)
        bqkv = w_ref[vrow + 0:vrow + 1, 0:3 * H]
        bo   = w_ref[vrow + 1:vrow + 2, 0 * H:1 * H]
        ln1g = w_ref[vrow + 1:vrow + 2, 1 * H:2 * H]
        ln1b = w_ref[vrow + 1:vrow + 2, 2 * H:3 * H]
        bi   = w_ref[vrow + 2:vrow + 3, 0:I]
        bo2  = w_ref[vrow + 3:vrow + 4, 0 * H:1 * H]
        ln2g = w_ref[vrow + 3:vrow + 4, 1 * H:2 * H]
        ln2b = w_ref[vrow + 3:vrow + 4, 2 * H:3 * H]

        # Fused q/k/v projection: one (BS,H) x (H,3H) matmul.
        qkv = jnp.dot(x, wqkv, preferred_element_type=jnp.float32) + bqkv

        # Multi-head attention with pure 2-D ops: per-head NT dots for scores,
        # one batched softmax over a sublane concat, per-head context dots,
        # single lane concat for ctx.  No 3-D stacks / transposes.
        scores, vals = [], []
        for h in range(NH):
            qh = qkv[:, 0 * H + h * HD:0 * H + (h + 1) * HD]   # (BS, HD)
            kh = qkv[:, 1 * H + h * HD:1 * H + (h + 1) * HD]
            vals.append(qkv[:, 2 * H + h * HD:2 * H + (h + 1) * HD])
            scores.append(jax.lax.dot_general(
                qh, kh, (((1,), (1,)), ((), ())),
                preferred_element_type=jnp.float32))           # (BS, BS)
        s_all = jnp.concatenate(scores, axis=0) * inv_sqrt_d + bias_h  # (NH*BS, BS)
        s_all = s_all - jnp.max(s_all, axis=-1, keepdims=True)
        p_all = jnp.exp(s_all)
        p_all = p_all / jnp.sum(p_all, axis=-1, keepdims=True)
        ctx = jnp.concatenate(
            [jnp.dot(p_all[h * BS:(h + 1) * BS, :], vals[h],
                     preferred_element_type=jnp.float32) for h in range(NH)],
            axis=-1)                                           # (BS, H)

        # BertSelfOutput: dense + residual + LN
        attn = jnp.dot(ctx, wo, preferred_element_type=jnp.float32) + bo
        x1 = _layer_norm(attn + x, ln1g, ln1b)

        # BertIntermediate + BertOutput: dense -> gelu -> dense + residual + LN
        inter = _gelu(jnp.dot(x1, wi, preferred_element_type=jnp.float32) + bi)
        ffn = jnp.dot(inter, wo2, preferred_element_type=jnp.float32) + bo2
        x = _layer_norm(ffn + x1, ln2g, ln2b)

    # TODO(synk): once BS*H grows, store a lane-dense (BS*H/128, 128) slab here
    # instead (masked 32-lane stores are negligible at this 2 KiB output).
    o_ref[...] = x


# ------------------------ parameter slab packing ----------------------------
def pack_params(params):
    """Pack every parameter into one lane-dense (SLAB_ROWS, 128) f32 slab.
    Every block is placed at lane 0 (zero-padded to 128 lanes) so the kernel
    only ever does static row/col slices with no realignment."""
    def pad_lanes(m):
        m = jnp.asarray(m, jnp.float32)
        return jnp.pad(m, ((0, 0), (0, 128 - m.shape[1])))

    rows = [pad_lanes(params["word_emb"]),                                  # (VOCAB,128)
            pad_lanes(jnp.tile(params["pos_emb"][:SEQ], (BATCH, 1)))]       # (BS,128)
    for lp in params["layers"]:
        wqkv = jnp.concatenate([lp["wq"], lp["wk"], lp["wv"]], axis=1)      # (H,3H)
        rows += [pad_lanes(wqkv), pad_lanes(lp["wo"]),
                 pad_lanes(lp["wi"]), pad_lanes(lp["wo2"])]
    rows.append(pad_lanes(jnp.concatenate(
        [params["emb_ln_g"], params["emb_ln_b"],
         params["type_emb"][0:1], params["type_emb"][1:2]], axis=1)))       # (1,128)
    for lp in params["layers"]:
        rows += [
            pad_lanes(jnp.concatenate([lp["bq"], lp["bk"], lp["bv"]], axis=1)),
            pad_lanes(jnp.concatenate([lp["bo"], lp["ln1_g"], lp["ln1_b"]], axis=1)),
            pad_lanes(lp["bi"]),
            pad_lanes(jnp.concatenate([lp["bo2"], lp["ln2_g"], lp["ln2_b"]], axis=1)),
        ]
    slab = jnp.concatenate(rows, axis=0)
    assert slab.shape == (SLAB_ROWS_RAW, 128), slab.shape
    return jnp.pad(slab, ((0, SLAB_ROWS - SLAB_ROWS_RAW), (0, 0)))


# ------------------------------ wrapper -------------------------------------
def _full_spec(shape):
    zeros = (0,) * len(shape)
    return pl.BlockSpec(shape, lambda i, _z=zeros: _z)


@jax.jit
def bert_model_forward(wslab, input_ids, token_type_ids, attention_mask):
    B, S = input_ids.shape
    H = HIDDEN
    bs = B * S

    # Block-diagonal additive attention bias over the flat token axis:
    # 0 where attend, -1e9 where masked, -1e9 for cross-batch pairs
    # (exp underflows to exactly 0 after max-subtraction -> identical to the
    #  torch masked_fill(-1e9) + per-batch softmax semantics).
    # TODO(synk): for large B*S, generate this in-kernel from key masks /
    # segment ids via iota compares instead of an O((B*S)^2) HBM array.
    blk = (attention_mask.astype(jnp.float32) - 1.0) * 1e9            # (B,S,S)
    same = jnp.eye(B, dtype=bool)[:, None, :, None]                   # (B,1,B,1)
    bias = jnp.where(same, blk[:, :, None, :],
                     jnp.float32(-1e9)).reshape(bs, bs)               # (bs,bs)

    ids = jnp.stack([input_ids.reshape(bs), token_type_ids.reshape(bs)],
                    axis=1).astype(jnp.int32)                         # (bs, 2)

    # TODO(synk): on v7x (2 TensorCores, 64 MiB VMEM) add a batch-parallel
    # leading grid axis + row tiling once B*S is large enough to amortize the
    # per-step overhead; everything-resident + grid=(1,) is optimal at this size.
    out = pl.pallas_call(
        bert_fused_kernel,
        out_shape=jax.ShapeDtypeStruct((bs, H), jnp.float32),
        grid=(1,),
        in_specs=[_full_spec(tuple(wslab.shape)),
                  _full_spec((bs, bs)),
                  _full_spec((bs, 2))],
        out_specs=_full_spec((bs, H)),
        compiler_params=pltpu.CompilerParams(dimension_semantics=("arbitrary",)),
    )(wslab, bias, ids)
    return out.reshape(B, S, H)


# -------------------------- deterministic params ----------------------------
def init_params(key):
    ks = jax.random.split(key, 3 + NUM_LAYERS)

    def norm(k, shape):
        return 0.02 * jax.random.normal(k, shape, jnp.float32)

    params = {
        "word_emb": norm(ks[0], (VOCAB, HIDDEN)).at[0].set(0.0),   # padding_idx=0
        "pos_emb": norm(ks[1], (MAX_POS, HIDDEN)),
        "type_emb": norm(ks[2], (TYPE_VOCAB, HIDDEN)),
        "emb_ln_g": jnp.ones((1, HIDDEN), jnp.float32),
        "emb_ln_b": jnp.zeros((1, HIDDEN), jnp.float32),
        "layers": [],
    }
    for i in range(NUM_LAYERS):
        lk = jax.random.split(ks[3 + i], 10)
        params["layers"].append({
            "wq": norm(lk[0], (HIDDEN, HIDDEN)), "bq": norm(lk[1], (1, HIDDEN)),
            "wk": norm(lk[2], (HIDDEN, HIDDEN)), "bk": norm(lk[3], (1, HIDDEN)),
            "wv": norm(lk[4], (HIDDEN, HIDDEN)), "bv": norm(lk[5], (1, HIDDEN)),
            "wo": norm(lk[6], (HIDDEN, HIDDEN)), "bo": norm(lk[7], (1, HIDDEN)),
            "ln1_g": jnp.ones((1, HIDDEN), jnp.float32),
            "ln1_b": jnp.zeros((1, HIDDEN), jnp.float32),
            "wi": norm(lk[8], (HIDDEN, INTERMEDIATE)),
            "bi": jnp.zeros((1, INTERMEDIATE), jnp.float32),
            "wo2": norm(lk[9], (INTERMEDIATE, HIDDEN)),
            "bo2": jnp.zeros((1, HIDDEN), jnp.float32),
            "ln2_g": jnp.ones((1, HIDDEN), jnp.float32),
            "ln2_b": jnp.zeros((1, HIDDEN), jnp.float32),
        })
    return params


# ------------------------------ pure-JAX ref --------------------------------
def ref_forward(params, input_ids, token_type_ids, mask):
    B, S = input_ids.shape
    x = (params["word_emb"][input_ids]
         + params["pos_emb"][jnp.arange(S)][None]
         + params["type_emb"][token_type_ids])
    x = _layer_norm(x, params["emb_ln_g"], params["emb_ln_b"])
    for lp in params["layers"]:
        q = x @ lp["wq"] + lp["bq"]
        k = x @ lp["wk"] + lp["bk"]
        v = x @ lp["wv"] + lp["bv"]

        def split(t):
            return t.reshape(B, S, NUM_HEADS, HEAD_DIM).transpose(0, 2, 1, 3)

        qh, kh, vh = split(q), split(k), split(v)
        scores = jnp.einsum("bhqd,bhkd->bhqk", qh, kh) / math.sqrt(HEAD_DIM)
        scores = jnp.where(mask[:, None, :, :] == 0, -1e9, scores)
        p = jax.nn.softmax(scores, axis=-1)
        ctx = jnp.einsum("bhqk,bhkd->bhqd", p, vh).transpose(0, 2, 1, 3).reshape(B, S, HIDDEN)
        x1 = _layer_norm(ctx @ lp["wo"] + lp["bo"] + x, lp["ln1_g"], lp["ln1_b"])
        inter = _gelu(x1 @ lp["wi"] + lp["bi"])
        x = _layer_norm(inter @ lp["wo2"] + lp["bo2"] + x1, lp["ln2_g"], lp["ln2_b"])
    return x


# --------------------------------- main -------------------------------------
if __name__ == "__main__":
    key = jax.random.PRNGKey(0)
    pkey, ikey, tkey = jax.random.split(key, 3)
    params = init_params(pkey)
    wslab = pack_params(params)          # packed once (param-only, input-free)

    input_ids = jax.random.randint(ikey, (BATCH, SEQ), 1, VOCAB)
    token_type_ids = jax.random.randint(tkey, (BATCH, SEQ), 0, TYPE_VOCAB)

    # per-sequence valid lengths -> (B, S, S) mask, 1 = attend, 0 = masked
    lengths = jnp.array([SEQ, SEQ - 3])
    key_mask = (jnp.arange(SEQ)[None, :] < lengths[:, None]).astype(jnp.float32)  # (B, S)
    attention_mask = jnp.broadcast_to(key_mask[:, None, :], (BATCH, SEQ, SEQ))

    out = bert_model_forward(wslab, input_ids, token_type_ids, attention_mask)
    out = jax.block_until_ready(out)

    ref = ref_forward(params, input_ids, token_type_ids, attention_mask)
    assert out.shape == (BATCH, SEQ, HIDDEN)
    max_err = float(jnp.max(jnp.abs(out - ref)))
    assert jnp.allclose(out, ref, rtol=1e-4, atol=1e-4), f"max abs err {max_err}"
    print("KERNEL_OK")
</pallas_src>

<mosaic_0001>
module attributes {stable_mosaic.version = 11 : i64} {
  func.func @bert_fused_kernel(%arg0: i32, %arg1: memref<416x128xf32, #tpu.memory_space<vmem>>, %arg2: memref<16x16xf32, #tpu.memory_space<vmem>>, %arg3: memref<16x2xi32, #tpu.memory_space<vmem>>, %arg4: memref<16x32xf32, #tpu.memory_space<vmem>>) attributes {dimension_semantics = [#tpu.dimension_semantics<arbitrary>], iteration_bounds = array<i64: 1>, scalar_prefetch = 0 : i64, scratch_operands = 0 : i64, tpu.core_type = #tpu.core_type<tc>, window_params = [{pipeline_mode = #tpu.pipeline_mode<synchronous>, transform_indices = @transform_0, window_bounds = array<i64: 416, 128>}, {pipeline_mode = #tpu.pipeline_mode<synchronous>, transform_indices = @transform_1, window_bounds = array<i64: 16, 16>}, {pipeline_mode = #tpu.pipeline_mode<synchronous>, transform_indices = @transform_2, window_bounds = array<i64: 16, 2>}, {pipeline_mode = #tpu.pipeline_mode<synchronous>, transform_indices = @transform_3, window_bounds = array<i64: 16, 32>}]} {
    %c0 = arith.constant 0 : index
    %c0_0 = arith.constant 0 : index
    %0 = vector.load %arg3[%c0, %c0_0] : memref<16x2xi32, #tpu.memory_space<vmem>>, vector<16x2xi32>
    %1 = vector.extract_strided_slice %0 {offsets = [0, 0], sizes = [16, 1], strides = [1, 1]} : vector<16x2xi32> to vector<16x1xi32>
    %2 = vector.extract_strided_slice %0 {offsets = [0, 1], sizes = [16, 1], strides = [1, 1]} : vector<16x2xi32> to vector<16x1xi32>
    %3 = tpu.iota {dimensions = array<i32: 1>} : vector<16x64xi32>
    %4 = vector.broadcast %1 : vector<16x1xi32> to vector<16x64xi32>
    %5 = arith.cmpi eq, %3, %4 : vector<16x64xi32>
    %cst = arith.constant 1.000000e+00 : f32
    %cst_1 = arith.constant 0.000000e+00 : f32
    %6 = vector.broadcast %cst : f32 to vector<16x64xf32>
    %7 = vector.broadcast %cst_1 : f32 to vector<16x64xf32>
    %8 = arith.select %5, %6, %7 : vector<16x64xi1>, vector<16x64xf32>
    %c0_2 = arith.constant 0 : index
    %c0_3 = arith.constant 0 : index
    %9 = vector.load %arg1[%c0_2, %c0_3] : memref<416x128xf32, #tpu.memory_space<vmem>>, vector<64x32xf32>
    %cst_4 = arith.constant dense<0.000000e+00> : vector<16x32xf32>
    %10 = tpu.matmul %8, %9, %cst_4 {dimension_numbers = #tpu.dot_dimension_numbers<[1], [0], [0], [1], [0, 0, 1, 1], [], []>} : vector<16x64xf32>, vector<64x32xf32>, vector<16x32xf32> -> vector<16x32xf32>
    %c64 = arith.constant 64 : index
    %c0_5 = arith.constant 0 : index
    %11 = vector.load %arg1[%c64, %c0_5] : memref<416x128xf32, #tpu.memory_space<vmem>>, vector<16x32xf32>
    %c400 = arith.constant 400 : index
    %c0_6 = arith.constant 0 : index
    %12 = vector.load %arg1[%c400, %c0_6] : memref<416x128xf32, #tpu.memory_space<vmem>>, vector<1x32xf32>
    %c400_7 = arith.constant 400 : index
    %c32 = arith.constant 32 : index
    %13 = vector.load %arg1[%c400_7, %c32] : memref<416x128xf32, #tpu.memory_space<vmem>>, vector<1x32xf32>
    %c400_8 = arith.constant 400 : index
    %c64_9 = arith.constant 64 : index
    %14 = vector.load %arg1[%c400_8, %c64_9] : memref<416x128xf32, #tpu.memory_space<vmem>>, vector<1x32xf32>
    %c400_10 = arith.constant 400 : index
    %c96 = arith.constant 96 : index
    %15 = vector.load %arg1[%c400_10, %c96] : memref<416x128xf32, #tpu.memory_space<vmem>>, vector<1x32xf32>
    %c0_i32 = arith.constant 0 : i32
    %16 = vector.broadcast %c0_i32 : i32 to vector<16x1xi32>
    %17 = arith.cmpi eq, %2, %16 : vector<16x1xi32>
    %18 = vector.shape_cast %17 : vector<16x1xi1> to vector<16x1xi1>
    %19 = vector.broadcast %18 : vector<16x1xi1> to vector<16x32xi1>
    %20 = vector.shape_cast %14 : vector<1x32xf32> to vector<1x32xf32>
    %21 = vector.broadcast %20 : vector<1x32xf32> to vector<16x32xf32>
    %22 = vector.shape_cast %15 : vector<1x32xf32> to vector<1x32xf32>
    %23 = vector.broadcast %22 : vector<1x32xf32> to vector<16x32xf32>
    %24 = arith.select %19, %21, %23 : vector<16x32xi1>, vector<16x32xf32>
    %25 = arith.addf %10, %11 : vector<16x32xf32>
    %26 = arith.addf %25, %24 : vector<16x32xf32>
    %cst_11 = arith.constant dense<0.000000e+00> : vector<16xf32>
    %27 = vector.multi_reduction <add>, %26, %cst_11 [1] : vector<16x32xf32> to vector<16xf32>
    %28 = vector.shape_cast %27 : vector<16xf32> to vector<16x1xf32>
    %cst_12 = arith.constant 3.200000e+01 : f32
    %29 = vector.broadcast %cst_12 : f32 to vector<16x1xf32>
    %30 = arith.divf %28, %29 : vector<16x1xf32>
    %31 = vector.broadcast %30 : vector<16x1xf32> to vector<16x32xf32>
    %32 = arith.subf %26, %31 : vector<16x32xf32>
    %33 = arith.mulf %32, %32 : vector<16x32xf32>
    %cst_13 = arith.constant dense<0.000000e+00> : vector<16xf32>
    %34 = vector.multi_reduction <add>, %33, %cst_13 [1] : vector<16x32xf32> to vector<16xf32>
    %35 = vector.shape_cast %34 : vector<16xf32> to vector<16x1xf32>
    %cst_14 = arith.constant 3.200000e+01 : f32
    %36 = vector.broadcast %cst_14 : f32 to vector<16x1xf32>
    %37 = arith.divf %35, %36 : vector<16x1xf32>
    %38 = vector.broadcast %30 : vector<16x1xf32> to vector<16x32xf32>
    %39 = arith.subf %26, %38 : vector<16x32xf32>
    %cst_15 = arith.constant 9.99999996E-13 : f32
    %40 = vector.broadcast %cst_15 : f32 to vector<16x1xf32>
    %41 = arith.addf %37, %40 : vector<16x1xf32>
    %42 = math.rsqrt %41 : vector<16x1xf32>
    %43 = vector.broadcast %42 : vector<16x1xf32> to vector<16x32xf32>
    %44 = arith.mulf %39, %43 : vector<16x32xf32>
    %45 = vector.broadcast %12 : vector<1x32xf32> to vector<16x32xf32>
    %46 = arith.mulf %44, %45 : vector<16x32xf32>
    %47 = vector.broadcast %13 : vector<1x32xf32> to vector<16x32xf32>
    %48 = arith.addf %46, %47 : vector<16x32xf32>
    %c0_16 = arith.constant 0 : index
    %c0_17 = arith.constant 0 : index
    %49 = vector.load %arg2[%c0_16, %c0_17] : memref<16x16xf32, #tpu.memory_space<vmem>>, vector<16x16xf32>
    %50 = tpu.concatenate %49, %49, %49, %49 in 0 : vector<16x16xf32>, vector<16x16xf32>, vector<16x16xf32>, vector<16x16xf32> -> vector<64x16xf32>
    %c80 = arith.constant 80 : index
    %c0_18 = arith.constant 0 : index
    %51 = vector.load %arg1[%c80, %c0_18] : memref<416x128xf32, #tpu.memory_space<vmem>>, vector<32x96xf32>
    %c112 = arith.constant 112 : index
    %c0_19 = arith.constant 0 : index
    %52 = vector.load %arg1[%c112, %c0_19] : memref<416x128xf32, #tpu.memory_space<vmem>>, vector<32x32xf32>
    %c144 = arith.constant 144 : index
    %c0_20 = arith.constant 0 : index
    %53 = vector.load %arg1[%c144, %c0_20] : memref<416x128xf32, #tpu.memory_space<vmem>>, vector<32x64xf32>
    %c176 = arith.constant 176 : index
    %c0_21 = arith.constant 0 : index
    %54 = vector.load %arg1[%c176, %c0_21] : memref<416x128xf32, #tpu.memory_space<vmem>>, vector<64x32xf32>
    %c401 = arith.constant 401 : index
    %c0_22 = arith.constant 0 : index
    %55 = vector.load %arg1[%c401, %c0_22] : memref<416x128xf32, #tpu.memory_space<vmem>>, vector<1x96xf32>
    %c402 = arith.constant 402 : index
    %c0_23 = arith.constant 0 : index
    %56 = vector.load %arg1[%c402, %c0_23] : memref<416x128xf32, #tpu.memory_space<vmem>>, vector<1x32xf32>
    %c402_24 = arith.constant 402 : index
    %c32_25 = arith.constant 32 : index
    %57 = vector.load %arg1[%c402_24, %c32_25] : memref<416x128xf32, #tpu.memory_space<vmem>>, vector<1x32xf32>
    %c402_26 = arith.constant 402 : index
    %c64_27 = arith.constant 64 : index
    %58 = vector.load %arg1[%c402_26, %c64_27] : memref<416x128xf32, #tpu.memory_space<vmem>>, vector<1x32xf32>
    %c403 = arith.constant 403 : index
    %c0_28 = arith.constant 0 : index
    %59 = vector.load %arg1[%c403, %c0_28] : memref<416x128xf32, #tpu.memory_space<vmem>>, vector<1x64xf32>
    %c404 = arith.constant 404 : index
    %c0_29 = arith.constant 0 : index
    %60 = vector.load %arg1[%c404, %c0_29] : memref<416x128xf32, #tpu.memory_space<vmem>>, vector<1x32xf32>
    %c404_30 = arith.constant 404 : index
    %c32_31 = arith.constant 32 : index
    %61 = vector.load %arg1[%c404_30, %c32_31] : memref<416x128xf32, #tpu.memory_space<vmem>>, vector<1x32xf32>
    %c404_32 = arith.constant 404 : index
    %c64_33 = arith.constant 64 : index
    %62 = vector.load %arg1[%c404_32, %c64_33] : memref<416x128xf32, #tpu.memory_space<vmem>>, vector<1x32xf32>
    %cst_34 = arith.constant dense<0.000000e+00> : vector<16x96xf32>
    %63 = tpu.matmul %48, %51, %cst_34 {dimension_numbers = #tpu.dot_dimension_numbers<[1], [0], [0], [1], [0, 0, 1, 1], [], []>} : vector<16x32xf32>, vector<32x96xf32>, vector<16x96xf32> -> vector<16x96xf32>
    %64 = vector.broadcast %55 : vector<1x96xf32> to vector<16x96xf32>
    %65 = arith.addf %63, %64 : vector<16x96xf32>
    %66 = vector.extract_strided_slice %65 {offsets = [0, 0], sizes = [16, 8], strides = [1, 1]} : vector<16x96xf32> to vector<16x8xf32>
    %67 = vector.extract_strided_slice %65 {offsets = [0, 32], sizes = [16, 8], strides = [1, 1]} : vector<16x96xf32> to vector<16x8xf32>
    %68 = vector.extract_strided_slice %65 {offsets = [0, 64], sizes = [16, 8], strides = [1, 1]} : vector<16x96xf32> to vector<16x8xf32>
    %cst_35 = arith.constant dense<0.000000e+00> : vector<16x16xf32>
    %69 = tpu.matmul %66, %67, %cst_35 {dimension_numbers = #tpu.dot_dimension_numbers<[1], [1], [0], [0], [0, 0, 1, 0], [], []>} : vector<16x8xf32>, vector<16x8xf32>, vector<16x16xf32> -> vector<16x16xf32>
    %70 = vector.extract_strided_slice %65 {offsets = [0, 8], sizes = [16, 8], strides = [1, 1]} : vector<16x96xf32> to vector<16x8xf32>
    %71 = vector.extract_strided_slice %65 {offsets = [0, 40], sizes = [16, 8], strides = [1, 1]} : vector<16x96xf32> to vector<16x8xf32>
    %72 = vector.extract_strided_slice %65 {offsets = [0, 72], sizes = [16, 8], strides = [1, 1]} : vector<16x96xf32> to vector<16x8xf32>
    %cst_36 = arith.constant dense<0.000000e+00> : vector<16x16xf32>
    %73 = tpu.matmul %70, %71, %cst_36 {dimension_numbers = #tpu.dot_dimension_numbers<[1], [1], [0], [0], [0, 0, 1, 0], [], []>} : vector<16x8xf32>, vector<16x8xf32>, vector<16x16xf32> -> vector<16x16xf32>
    %74 = vector.extract_strided_slice %65 {offsets = [0, 16], sizes = [16, 8], strides = [1, 1]} : vector<16x96xf32> to vector<16x8xf32>
    %75 = vector.extract_strided_slice %65 {offsets = [0, 48], sizes = [16, 8], strides = [1, 1]} : vector<16x96xf32> to vector<16x8xf32>
    %76 = vector.extract_strided_slice %65 {offsets = [0, 80], sizes = [16, 8], strides = [1, 1]} : vector<16x96xf32> to vector<16x8xf32>
    %cst_37 = arith.constant dense<0.000000e+00> : vector<16x16xf32>
    %77 = tpu.matmul %74, %75, %cst_37 {dimension_numbers = #tpu.dot_dimension_numbers<[1], [1], [0], [0], [0, 0, 1, 0], [], []>} : vector<16x8xf32>, vector<16x8xf32>, vector<16x16xf32> -> vector<16x16xf32>
    %78 = vector.extract_strided_slice %65 {offsets = [0, 24], sizes = [16, 8], strides = [1, 1]} : vector<16x96xf32> to vector<16x8xf32>
    %79 = vector.extract_strided_slice %65 {offsets = [0, 56], sizes = [16, 8], strides = [1, 1]} : vector<16x96xf32> to vector<16x8xf32>
    %80 = vector.extract_strided_slice %65 {offsets = [0, 88], sizes = [16, 8], strides = [1, 1]} : vector<16x96xf32> to vector<16x8xf32>
    %cst_38 = arith.constant dense<0.000000e+00> : vector<16x16xf32>
    %81 = tpu.matmul %78, %79, %cst_38 {dimension_numbers = #tpu.dot_dimension_numbers<[1], [1], [0], [0], [0, 0, 1, 0], [], []>} : vector<16x8xf32>, vector<16x8xf32>, vector<16x16xf32> -> vector<16x16xf32>
    %82 = tpu.concatenate %69, %73, %77, %81 in 0 : vector<16x16xf32>, vector<16x16xf32>, vector<16x16xf32>, vector<16x16xf32> -> vector<64x16xf32>
    %cst_39 = arith.constant 0.353553385 : f32
    %83 = vector.broadcast %cst_39 : f32 to vector<64x16xf32>
    %84 = arith.mulf %82, %83 : vector<64x16xf32>
    %85 = arith.addf %84, %50 : vector<64x16xf32>
    %cst_40 = arith.constant dense<0xFF800000> : vector<64xf32>
    %86 = vector.multi_reduction <maximumf>, %85, %cst_40 [1] : vector<64x16xf32> to vector<64xf32>
    %87 = vector.shape_cast %86 : vector<64xf32> to vector<64x1xf32>
    %88 = vector.broadcast %87 : vector<64x1xf32> to vector<64x16xf32>
    %89 = arith.subf %85, %88 : vector<64x16xf32>
    %90 = math.exp %89 : vector<64x16xf32>
    %cst_41 = arith.constant dense<0.000000e+00> : vector<64xf32>
    %91 = vector.multi_reduction <add>, %90, %cst_41 [1] : vector<64x16xf32> to vector<64xf32>
    %92 = vector.shape_cast %91 : vector<64xf32> to vector<64x1xf32>
    %93 = vector.broadcast %92 : vector<64x1xf32> to vector<64x16xf32>
    %94 = arith.divf %90, %93 : vector<64x16xf32>
    %95 = vector.extract_strided_slice %94 {offsets = [0, 0], sizes = [16, 16], strides = [1, 1]} : vector<64x16xf32> to vector<16x16xf32>
    %cst_42 = arith.constant dense<0.000000e+00> : vector<16x8xf32>
    %96 = tpu.matmul %95, %68, %cst_42 {dimension_numbers = #tpu.dot_dimension_numbers<[1], [0], [0], [1], [0, 0, 1, 1], [], []>} : vector<16x16xf32>, vector<16x8xf32>, vector<16x8xf32> -> vector<16x8xf32>
    %97 = vector.extract_strided_slice %94 {offsets = [16, 0], sizes = [16, 16], strides = [1, 1]} : vector<64x16xf32> to vector<16x16xf32>
    %cst_43 = arith.constant dense<0.000000e+00> : vector<16x8xf32>
    %98 = tpu.matmul %97, %72, %cst_43 {dimension_numbers = #tpu.dot_dimension_numbers<[1], [0], [0], [1], [0, 0, 1, 1], [], []>} : vector<16x16xf32>, vector<16x8xf32>, vector<16x8xf32> -> vector<16x8xf32>
    %99 = vector.extract_strided_slice %94 {offsets = [32, 0], sizes = [16, 16], strides = [1, 1]} : vector<64x16xf32> to vector<16x16xf32>
    %cst_44 = arith.constant dense<0.000000e+00> : vector<16x8xf32>
    %100 = tpu.matmul %99, %76, %cst_44 {dimension_numbers = #tpu.dot_dimension_numbers<[1], [0], [0], [1], [0, 0, 1, 1], [], []>} : vector<16x16xf32>, vector<16x8xf32>, vector<16x8xf32> -> vector<16x8xf32>
    %101 = vector.extract_strided_slice %94 {offsets = [48, 0], sizes = [16, 16], strides = [1, 1]} : vector<64x16xf32> to vector<16x16xf32>
    %cst_45 = arith.constant dense<0.000000e+00> : vector<16x8xf32>
    %102 = tpu.matmul %101, %80, %cst_45 {dimension_numbers = #tpu.dot_dimension_numbers<[1], [0], [0], [1], [0, 0, 1, 1], [], []>} : vector<16x16xf32>, vector<16x8xf32>, vector<16x8xf32> -> vector<16x8xf32>
    %103 = tpu.concatenate %96, %98, %100, %102 in 1 : vector<16x8xf32>, vector<16x8xf32>, vector<16x8xf32>, vector<16x8xf32> -> vector<16x32xf32>
    %cst_46 = arith.constant dense<0.000000e+00> : vector<16x32xf32>
    %104 = tpu.matmul %103, %52, %cst_46 {dimension_numbers = #tpu.dot_dimension_numbers<[1], [0], [0], [1], [0, 0, 1, 1], [], []>} : vector<16x32xf32>, vector<32x32xf32>, vector<16x32xf32> -> vector<16x32xf32>
    %105 = vector.broadcast %56 : vector<1x32xf32> to vector<16x32xf32>
    %106 = arith.addf %104, %105 : vector<16x32xf32>
    %107 = arith.addf %106, %48 : vector<16x32xf32>
    %cst_47 = arith.constant dense<0.000000e+00> : vector<16xf32>
    %108 = vector.multi_reduction <add>, %107, %cst_47 [1] : vector<16x32xf32> to vector<16xf32>
    %109 = vector.shape_cast %108 : vector<16xf32> to vector<16x1xf32>
    %cst_48 = arith.constant 3.200000e+01 : f32
    %110 = vector.broadcast %cst_48 : f32 to vector<16x1xf32>
    %111 = arith.divf %109, %110 : vector<16x1xf32>
    %112 = vector.broadcast %111 : vector<16x1xf32> to vector<16x32xf32>
    %113 = arith.subf %107, %112 : vector<16x32xf32>
    %114 = arith.mulf %113, %113 : vector<16x32xf32>
    %cst_49 = arith.constant dense<0.000000e+00> : vector<16xf32>
    %115 = vector.multi_reduction <add>, %114, %cst_49 [1] : vector<16x32xf32> to vector<16xf32>
    %116 = vector.shape_cast %115 : vector<16xf32> to vector<16x1xf32>
    %cst_50 = arith.constant 3.200000e+01 : f32
    %117 = vector.broadcast %cst_50 : f32 to vector<16x1xf32>
    %118 = arith.divf %116, %117 : vector<16x1xf32>
    %119 = vector.broadcast %111 : vector<16x1xf32> to vector<16x32xf32>
    %120 = arith.subf %107, %119 : vector<16x32xf32>
    %cst_51 = arith.constant 9.99999996E-13 : f32
    %121 = vector.broadcast %cst_51 : f32 to vector<16x1xf32>
    %122 = arith.addf %118, %121 : vector<16x1xf32>
    %123 = math.rsqrt %122 : vector<16x1xf32>
    %124 = vector.broadcast %123 : vector<16x1xf32> to vector<16x32xf32>
    %125 = arith.mulf %120, %124 : vector<16x32xf32>
    %126 = vector.broadcast %57 : vector<1x32xf32> to vector<16x32xf32>
    %127 = arith.mulf %125, %126 : vector<16x32xf32>
    %128 = vector.broadcast %58 : vector<1x32xf32> to vector<16x32xf32>
    %129 = arith.addf %127, %128 : vector<16x32xf32>
    %cst_52 = arith.constant dense<0.000000e+00> : vector<16x64xf32>
    %130 = tpu.matmul %129, %53, %cst_52 {dimension_numbers = #tpu.dot_dimension_numbers<[1], [0], [0], [1], [0, 0, 1, 1], [], []>} : vector<16x32xf32>, vector<32x64xf32>, vector<16x64xf32> -> vector<16x64xf32>
    %131 = vector.broadcast %59 : vector<1x64xf32> to vector<16x64xf32>
    %132 = arith.addf %130, %131 : vector<16x64xf32>
    %cst_53 = arith.constant 5.000000e-01 : f32
    %133 = vector.broadcast %cst_53 : f32 to vector<16x64xf32>
    %134 = arith.mulf %133, %132 : vector<16x64xf32>
    %cst_54 = arith.constant 4.471500e-02 : f32
    %135 = vector.broadcast %cst_54 : f32 to vector<16x64xf32>
    %136 = arith.mulf %135, %132 : vector<16x64xf32>
    %137 = arith.mulf %136, %132 : vector<16x64xf32>
    %138 = arith.mulf %137, %132 : vector<16x64xf32>
    %139 = arith.addf %132, %138 : vector<16x64xf32>
    %cst_55 = arith.constant 0.797884583 : f32
    %140 = vector.broadcast %cst_55 : f32 to vector<16x64xf32>
    %141 = arith.mulf %140, %139 : vector<16x64xf32>
    %142 = math.tanh %141 : vector<16x64xf32>
    %cst_56 = arith.constant 1.000000e+00 : f32
    %143 = vector.broadcast %cst_56 : f32 to vector<16x64xf32>
    %144 = arith.addf %143, %142 : vector<16x64xf32>
    %145 = arith.mulf %134, %144 : vector<16x64xf32>
    %cst_57 = arith.constant dense<0.000000e+00> : vector<16x32xf32>
    %146 = tpu.matmul %145, %54, %cst_57 {dimension_numbers = #tpu.dot_dimension_numbers<[1], [0], [0], [1], [0, 0, 1, 1], [], []>} : vector<16x64xf32>, vector<64x32xf32>, vector<16x32xf32> -> vector<16x32xf32>
    %147 = vector.broadcast %60 : vector<1x32xf32> to vector<16x32xf32>
    %148 = arith.addf %146, %147 : vector<16x32xf32>
    %149 = arith.addf %148, %129 : vector<16x32xf32>
    %cst_58 = arith.constant dense<0.000000e+00> : vector<16xf32>
    %150 = vector.multi_reduction <add>, %149, %cst_58 [1] : vector<16x32xf32> to vector<16xf32>
    %151 = vector.shape_cast %150 : vector<16xf32> to vector<16x1xf32>
    %cst_59 = arith.constant 3.200000e+01 : f32
    %152 = vector.broadcast %cst_59 : f32 to vector<16x1xf32>
    %153 = arith.divf %151, %152 : vector<16x1xf32>
    %154 = vector.broadcast %153 : vector<16x1xf32> to vector<16x32xf32>
    %155 = arith.subf %149, %154 : vector<16x32xf32>
    %156 = arith.mulf %155, %155 : vector<16x32xf32>
    %cst_60 = arith.constant dense<0.000000e+00> : vector<16xf32>
    %157 = vector.multi_reduction <add>, %156, %cst_60 [1] : vector<16x32xf32> to vector<16xf32>
    %158 = vector.shape_cast %157 : vector<16xf32> to vector<16x1xf32>
    %cst_61 = arith.constant 3.200000e+01 : f32
    %159 = vector.broadcast %cst_61 : f32 to vector<16x1xf32>
    %160 = arith.divf %158, %159 : vector<16x1xf32>
    %161 = vector.broadcast %153 : vector<16x1xf32> to vector<16x32xf32>
    %162 = arith.subf %149, %161 : vector<16x32xf32>
    %cst_62 = arith.constant 9.99999996E-13 : f32
    %163 = vector.broadcast %cst_62 : f32 to vector<16x1xf32>
    %164 = arith.addf %160, %163 : vector<16x1xf32>
    %165 = math.rsqrt %164 : vector<16x1xf32>
    %166 = vector.broadcast %165 : vector<16x1xf32> to vector<16x32xf32>
    %167 = arith.mulf %162, %166 : vector<16x32xf32>
    %168 = vector.broadcast %61 : vector<1x32xf32> to vector<16x32xf32>
    %169 = arith.mulf %167, %168 : vector<16x32xf32>
    %170 = vector.broadcast %62 : vector<1x32xf32> to vector<16x32xf32>
    %171 = arith.addf %169, %170 : vector<16x32xf32>
    %c240 = arith.constant 240 : index
    %c0_63 = arith.constant 0 : index
    %172 = vector.load %arg1[%c240, %c0_63] : memref<416x128xf32, #tpu.memory_space<vmem>>, vector<32x96xf32>
    %c272 = arith.constant 272 : index
    %c0_64 = arith.constant 0 : index
    %173 = vector.load %arg1[%c272, %c0_64] : memref<416x128xf32, #tpu.memory_space<vmem>>, vector<32x32xf32>
    %c304 = arith.constant 304 : index
    %c0_65 = arith.constant 0 : index
    %174 = vector.load %arg1[%c304, %c0_65] : memref<416x128xf32, #tpu.memory_space<vmem>>, vector<32x64xf32>
    %c336 = arith.constant 336 : index
    %c0_66 = arith.constant 0 : index
    %175 = vector.load %arg1[%c336, %c0_66] : memref<416x128xf32, #tpu.memory_space<vmem>>, vector<64x32xf32>
    %c405 = arith.constant 405 : index
    %c0_67 = arith.constant 0 : index
    %176 = vector.load %arg1[%c405, %c0_67] : memref<416x128xf32, #tpu.memory_space<vmem>>, vector<1x96xf32>
    %c406 = arith.constant 406 : index
    %c0_68 = arith.constant 0 : index
    %177 = vector.load %arg1[%c406, %c0_68] : memref<416x128xf32, #tpu.memory_space<vmem>>, vector<1x32xf32>
    %c406_69 = arith.constant 406 : index
    %c32_70 = arith.constant 32 : index
    %178 = vector.load %arg1[%c406_69, %c32_70] : memref<416x128xf32, #tpu.memory_space<vmem>>, vector<1x32xf32>
    %c406_71 = arith.constant 406 : index
    %c64_72 = arith.constant 64 : index
    %179 = vector.load %arg1[%c406_71, %c64_72] : memref<416x128xf32, #tpu.memory_space<vmem>>, vector<1x32xf32>
    %c407 = arith.constant 407 : index
    %c0_73 = arith.constant 0 : index
    %180 = vector.load %arg1[%c407, %c0_73] : memref<416x128xf32, #tpu.memory_space<vmem>>, vector<1x64xf32>
    %c408 = arith.constant 408 : index
    %c0_74 = arith.constant 0 : index
    %181 = vector.load %arg1[%c408, %c0_74] : memref<416x128xf32, #tpu.memory_space<vmem>>, vector<1x32xf32>
    %c408_75 = arith.constant 408 : index
    %c32_76 = arith.constant 32 : index
    %182 = vector.load %arg1[%c408_75, %c32_76] : memref<416x128xf32, #tpu.memory_space<vmem>>, vector<1x32xf32>
    %c408_77 = arith.constant 408 : index
    %c64_78 = arith.constant 64 : index
    %183 = vector.load %arg1[%c408_77, %c64_78] : memref<416x128xf32, #tpu.memory_space<vmem>>, vector<1x32xf32>
    %cst_79 = arith.constant dense<0.000000e+00> : vector<16x96xf32>
    %184 = tpu.matmul %171, %172, %cst_79 {dimension_numbers = #tpu.dot_dimension_numbers<[1], [0], [0], [1], [0, 0, 1, 1], [], []>} : vector<16x32xf32>, vector<32x96xf32>, vector<16x96xf32> -> vector<16x96xf32>
    %185 = vector.broadcast %176 : vector<1x96xf32> to vector<16x96xf32>
    %186 = arith.addf %184, %185 : vector<16x96xf32>
    %187 = vector.extract_strided_slice %186 {offsets = [0, 0], sizes = [16, 8], strides = [1, 1]} : vector<16x96xf32> to vector<16x8xf32>
    %188 = vector.extract_strided_slice %186 {offsets = [0, 32], sizes = [16, 8], strides = [1, 1]} : vector<16x96xf32> to vector<16x8xf32>
    %189 = vector.extract_strided_slice %186 {offsets = [0, 64], sizes = [16, 8], strides = [1, 1]} : vector<16x96xf32> to vector<16x8xf32>
    %cst_80 = arith.constant dense<0.000000e+00> : vector<16x16xf32>
    %190 = tpu.matmul %187, %188, %cst_80 {dimension_numbers = #tpu.dot_dimension_numbers<[1], [1], [0], [0], [0, 0, 1, 0], [], []>} : vector<16x8xf32>, vector<16x8xf32>, vector<16x16xf32> -> vector<16x16xf32>
    %191 = vector.extract_strided_slice %186 {offsets = [0, 8], sizes = [16, 8], strides = [1, 1]} : vector<16x96xf32> to vector<16x8xf32>
    %192 = vector.extract_strided_slice %186 {offsets = [0, 40], sizes = [16, 8], strides = [1, 1]} : vector<16x96xf32> to vector<16x8xf32>
    %193 = vector.extract_strided_slice %186 {offsets = [0, 72], sizes = [16, 8], strides = [1, 1]} : vector<16x96xf32> to vector<16x8xf32>
    %cst_81 = arith.constant dense<0.000000e+00> : vector<16x16xf32>
    %194 = tpu.matmul %191, %192, %cst_81 {dimension_numbers = #tpu.dot_dimension_numbers<[1], [1], [0], [0], [0, 0, 1, 0], [], []>} : vector<16x8xf32>, vector<16x8xf32>, vector<16x16xf32> -> vector<16x16xf32>
    %195 = vector.extract_strided_slice %186 {offsets = [0, 16], sizes = [16, 8], strides = [1, 1]} : vector<16x96xf32> to vector<16x8xf32>
    %196 = vector.extract_strided_slice %186 {offsets = [0, 48], sizes = [16, 8], strides = [1, 1]} : vector<16x96xf32> to vector<16x8xf32>
    %197 = vector.extract_strided_slice %186 {offsets = [0, 80], sizes = [16, 8], strides = [1, 1]} : vector<16x96xf32> to vector<16x8xf32>
    %cst_82 = arith.constant dense<0.000000e+00> : vector<16x16xf32>
    %198 = tpu.matmul %195, %196, %cst_82 {dimension_numbers = #tpu.dot_dimension_numbers<[1], [1], [0], [0], [0, 0, 1, 0], [], []>} : vector<16x8xf32>, vector<16x8xf32>, vector<16x16xf32> -> vector<16x16xf32>
    %199 = vector.extract_strided_slice %186 {offsets = [0, 24], sizes = [16, 8], strides = [1, 1]} : vector<16x96xf32> to vector<16x8xf32>
    %200 = vector.extract_strided_slice %186 {offsets = [0, 56], sizes = [16, 8], strides = [1, 1]} : vector<16x96xf32> to vector<16x8xf32>
    %201 = vector.extract_strided_slice %186 {offsets = [0, 88], sizes = [16, 8], strides = [1, 1]} : vector<16x96xf32> to vector<16x8xf32>
    %cst_83 = arith.constant dense<0.000000e+00> : vector<16x16xf32>
    %202 = tpu.matmul %199, %200, %cst_83 {dimension_numbers = #tpu.dot_dimension_numbers<[1], [1], [0], [0], [0, 0, 1, 0], [], []>} : vector<16x8xf32>, vector<16x8xf32>, vector<16x16xf32> -> vector<16x16xf32>
    %203 = tpu.concatenate %190, %194, %198, %202 in 0 : vector<16x16xf32>, vector<16x16xf32>, vector<16x16xf32>, vector<16x16xf32> -> vector<64x16xf32>
    %cst_84 = arith.constant 0.353553385 : f32
    %204 = vector.broadcast %cst_84 : f32 to vector<64x16xf32>
    %205 = arith.mulf %203, %204 : vector<64x16xf32>
    %206 = arith.addf %205, %50 : vector<64x16xf32>
    %cst_85 = arith.constant dense<0xFF800000> : vector<64xf32>
    %207 = vector.multi_reduction <maximumf>, %206, %cst_85 [1] : vector<64x16xf32> to vector<64xf32>
    %208 = vector.shape_cast %207 : vector<64xf32> to vector<64x1xf32>
    %209 = vector.broadcast %208 : vector<64x1xf32> to vector<64x16xf32>
    %210 = arith.subf %206, %209 : vector<64x16xf32>
    %211 = math.exp %210 : vector<64x16xf32>
    %cst_86 = arith.constant dense<0.000000e+00> : vector<64xf32>
    %212 = vector.multi_reduction <add>, %211, %cst_86 [1] : vector<64x16xf32> to vector<64xf32>
    %213 = vector.shape_cast %212 : vector<64xf32> to vector<64x1xf32>
    %214 = vector.broadcast %213 : vector<64x1xf32> to vector<64x16xf32>
    %215 = arith.divf %211, %214 : vector<64x16xf32>
    %216 = vector.extract_strided_slice %215 {offsets = [0, 0], sizes = [16, 16], strides = [1, 1]} : vector<64x16xf32> to vector<16x16xf32>
    %cst_87 = arith.constant dense<0.000000e+00> : vector<16x8xf32>
    %217 = tpu.matmul %216, %189, %cst_87 {dimension_numbers = #tpu.dot_dimension_numbers<[1], [0], [0], [1], [0, 0, 1, 1], [], []>} : vector<16x16xf32>, vector<16x8xf32>, vector<16x8xf32> -> vector<16x8xf32>
    %218 = vector.extract_strided_slice %215 {offsets = [16, 0], sizes = [16, 16], strides = [1, 1]} : vector<64x16xf32> to vector<16x16xf32>
    %cst_88 = arith.constant dense<0.000000e+00> : vector<16x8xf32>
    %219 = tpu.matmul %218, %193, %cst_88 {dimension_numbers = #tpu.dot_dimension_numbers<[1], [0], [0], [1], [0, 0, 1, 1], [], []>} : vector<16x16xf32>, vector<16x8xf32>, vector<16x8xf32> -> vector<16x8xf32>
    %220 = vector.extract_strided_slice %215 {offsets = [32, 0], sizes = [16, 16], strides = [1, 1]} : vector<64x16xf32> to vector<16x16xf32>
    %cst_89 = arith.constant dense<0.000000e+00> : vector<16x8xf32>
    %221 = tpu.matmul %220, %197, %cst_89 {dimension_numbers = #tpu.dot_dimension_numbers<[1], [0], [0], [1], [0, 0, 1, 1], [], []>} : vector<16x16xf32>, vector<16x8xf32>, vector<16x8xf32> -> vector<16x8xf32>
    %222 = vector.extract_strided_slice %215 {offsets = [48, 0], sizes = [16, 16], strides = [1, 1]} : vector<64x16xf32> to vector<16x16xf32>
    %cst_90 = arith.constant dense<0.000000e+00> : vector<16x8xf32>
    %223 = tpu.matmul %222, %201, %cst_90 {dimension_numbers = #tpu.dot_dimension_numbers<[1], [0], [0], [1], [0, 0, 1, 1], [], []>} : vector<16x16xf32>, vector<16x8xf32>, vector<16x8xf32> -> vector<16x8xf32>
    %224 = tpu.concatenate %217, %219, %221, %223 in 1 : vector<16x8xf32>, vector<16x8xf32>, vector<16x8xf32>, vector<16x8xf32> -> vector<16x32xf32>
    %cst_91 = arith.constant dense<0.000000e+00> : vector<16x32xf32>
    %225 = tpu.matmul %224, %173, %cst_91 {dimension_numbers = #tpu.dot_dimension_numbers<[1], [0], [0], [1], [0, 0, 1, 1], [], []>} : vector<16x32xf32>, vector<32x32xf32>, vector<16x32xf32> -> vector<16x32xf32>
    %226 = vector.broadcast %177 : vector<1x32xf32> to vector<16x32xf32>
    %227 = arith.addf %225, %226 : vector<16x32xf32>
    %228 = arith.addf %227, %171 : vector<16x32xf32>
    %cst_92 = arith.constant dense<0.000000e+00> : vector<16xf32>
    %229 = vector.multi_reduction <add>, %228, %cst_92 [1] : vector<16x32xf32> to vector<16xf32>
    %230 = vector.shape_cast %229 : vector<16xf32> to vector<16x1xf32>
    %cst_93 = arith.constant 3.200000e+01 : f32
    %231 = vector.broadcast %cst_93 : f32 to vector<16x1xf32>
    %232 = arith.divf %230, %231 : vector<16x1xf32>
    %233 = vector.broadcast %232 : vector<16x1xf32> to vector<16x32xf32>
    %234 = arith.subf %228, %233 : vector<16x32xf32>
    %235 = arith.mulf %234, %234 : vector<16x32xf32>
    %cst_94 = arith.constant dense<0.000000e+00> : vector<16xf32>
    %236 = vector.multi_reduction <add>, %235, %cst_94 [1] : vector<16x32xf32> to vector<16xf32>
    %237 = vector.shape_cast %236 : vector<16xf32> to vector<16x1xf32>
    %cst_95 = arith.constant 3.200000e+01 : f32
    %238 = vector.broadcast %cst_95 : f32 to vector<16x1xf32>
    %239 = arith.divf %237, %238 : vector<16x1xf32>
    %240 = vector.broadcast %232 : vector<16x1xf32> to vector<16x32xf32>
    %241 = arith.subf %228, %240 : vector<16x32xf32>
    %cst_96 = arith.constant 9.99999996E-13 : f32
    %242 = vector.broadcast %cst_96 : f32 to vector<16x1xf32>
    %243 = arith.addf %239, %242 : vector<16x1xf32>
    %244 = math.rsqrt %243 : vector<16x1xf32>
    %245 = vector.broadcast %244 : vector<16x1xf32> to vector<16x32xf32>
    %246 = arith.mulf %241, %245 : vector<16x32xf32>
    %247 = vector.broadcast %178 : vector<1x32xf32> to vector<16x32xf32>
    %248 = arith.mulf %246, %247 : vector<16x32xf32>
    %249 = vector.broadcast %179 : vector<1x32xf32> to vector<16x32xf32>
    %250 = arith.addf %248, %249 : vector<16x32xf32>
    %cst_97 = arith.constant dense<0.000000e+00> : vector<16x64xf32>
    %251 = tpu.matmul %250, %174, %cst_97 {dimension_numbers = #tpu.dot_dimension_numbers<[1], [0], [0], [1], [0, 0, 1, 1], [], []>} : vector<16x32xf32>, vector<32x64xf32>, vector<16x64xf32> -> vector<16x64xf32>
    %252 = vector.broadcast %180 : vector<1x64xf32> to vector<16x64xf32>
    %253 = arith.addf %251, %252 : vector<16x64xf32>
    %cst_98 = arith.constant 5.000000e-01 : f32
    %254 = vector.broadcast %cst_98 : f32 to vector<16x64xf32>
    %255 = arith.mulf %254, %253 : vector<16x64xf32>
    %cst_99 = arith.constant 4.471500e-02 : f32
    %256 = vector.broadcast %cst_99 : f32 to vector<16x64xf32>
    %257 = arith.mulf %256, %253 : vector<16x64xf32>
    %258 = arith.mulf %257, %253 : vector<16x64xf32>
    %259 = arith.mulf %258, %253 : vector<16x64xf32>
    %260 = arith.addf %253, %259 : vector<16x64xf32>
    %cst_100 = arith.constant 0.797884583 : f32
    %261 = vector.broadcast %cst_100 : f32 to vector<16x64xf32>
    %262 = arith.mulf %261, %260 : vector<16x64xf32>
    %263 = math.tanh %262 : vector<16x64xf32>
    %cst_101 = arith.constant 1.000000e+00 : f32
    %264 = vector.broadcast %cst_101 : f32 to vector<16x64xf32>
    %265 = arith.addf %264, %263 : vector<16x64xf32>
    %266 = arith.mulf %255, %265 : vector<16x64xf32>
    %cst_102 = arith.constant dense<0.000000e+00> : vector<16x32xf32>
    %267 = tpu.matmul %266, %175, %cst_102 {dimension_numbers = #tpu.dot_dimension_numbers<[1], [0], [0], [1], [0, 0, 1, 1], [], []>} : vector<16x64xf32>, vector<64x32xf32>, vector<16x32xf32> -> vector<16x32xf32>
    %268 = vector.broadcast %181 : vector<1x32xf32> to vector<16x32xf32>
    %269 = arith.addf %267, %268 : vector<16x32xf32>
    %270 = arith.addf %269, %250 : vector<16x32xf32>
    %cst_103 = arith.constant dense<0.000000e+00> : vector<16xf32>
    %271 = vector.multi_reduction <add>, %270, %cst_103 [1] : vector<16x32xf32> to vector<16xf32>
    %272 = vector.shape_cast %271 : vector<16xf32> to vector<16x1xf32>
    %cst_104 = arith.constant 3.200000e+01 : f32
    %273 = vector.broadcast %cst_104 : f32 to vector<16x1xf32>
    %274 = arith.divf %272, %273 : vector<16x1xf32>
    %275 = vector.broadcast %274 : vector<16x1xf32> to vector<16x32xf32>
    %276 = arith.subf %270, %275 : vector<16x32xf32>
    %277 = arith.mulf %276, %276 : vector<16x32xf32>
    %cst_105 = arith.constant dense<0.000000e+00> : vector<16xf32>
    %278 = vector.multi_reduction <add>, %277, %cst_105 [1] : vector<16x32xf32> to vector<16xf32>
    %279 = vector.shape_cast %278 : vector<16xf32> to vector<16x1xf32>
    %cst_106 = arith.constant 3.200000e+01 : f32
    %280 = vector.broadcast %cst_106 : f32 to vector<16x1xf32>
    %281 = arith.divf %279, %280 : vector<16x1xf32>
    %282 = vector.broadcast %274 : vector<16x1xf32> to vector<16x32xf32>
    %283 = arith.subf %270, %282 : vector<16x32xf32>
    %cst_107 = arith.constant 9.99999996E-13 : f32
    %284 = vector.broadcast %cst_107 : f32 to vector<16x1xf32>
    %285 = arith.addf %281, %284 : vector<16x1xf32>
    %286 = math.rsqrt %285 : vector<16x1xf32>
    %287 = vector.broadcast %286 : vector<16x1xf32> to vector<16x32xf32>
    %288 = arith.mulf %283, %287 : vector<16x32xf32>
    %289 = vector.broadcast %182 : vector<1x32xf32> to vector<16x32xf32>
    %290 = arith.mulf %288, %289 : vector<16x32xf32>
    %291 = vector.broadcast %183 : vector<1x32xf32> to vector<16x32xf32>
    %292 = arith.addf %290, %291 : vector<16x32xf32>
    %c0_108 = arith.constant 0 : index
    %c0_109 = arith.constant 0 : index
    %293 = vector.load %arg4[%c0_108, %c0_109] : memref<16x32xf32, #tpu.memory_space<vmem>>, vector<16x32xf32>
    tpu.vector_store %arg4[%c0_108, %c0_109], %292 {strides = array<i32>} : memref<16x32xf32, #tpu.memory_space<vmem>>, vector<16x32xf32>,
    return
  }
  func.func @transform_0(%arg0: i32) -> (i32, i32) {
    %c0_i32 = arith.constant 0 : i32
    %c0_i32_0 = arith.constant 0 : i32
    %c0_i32_1 = arith.constant 0 : i32
    return %c0_i32, %c0_i32_0 : i32, i32
  }
  func.func @transform_1(%arg0: i32) -> (i32, i32) {
    %c0_i32 = arith.constant 0 : i32
    %c0_i32_0 = arith.constant 0 : i32
    %c0_i32_1 = arith.constant 0 : i32
    return %c0_i32, %c0_i32_0 : i32, i32
  }
  func.func @transform_2(%arg0: i32) -> (i32, i32) {
    %c0_i32 = arith.constant 0 : i32
    %c0_i32_0 = arith.constant 0 : i32
    %c0_i32_1 = arith.constant 0 : i32
    return %c0_i32, %c0_i32_0 : i32, i32
  }
  func.func @transform_3(%arg0: i32) -> (i32, i32) {
    %c0_i32 = arith.constant 0 : i32
    %c0_i32_0 = arith.constant 0 : i32
    %c0_i32_1 = arith.constant 0 : i32
    return %c0_i32, %c0_i32_0 : i32, i32
  }
}

</mosaic_0001>

<bundles_post_ra>
// kernel: bert_model_forward.1
= control target key start
LH: loop header
LB: loop body
LE: loop exit
PB: predicated region body
PF: predicated region fallthrough
CT: control target
= control target key end

     0   :  { %8 = vsyncpa [#allocation3], 0  ;;  %s4057_s0 = inlined_call_operand.hbm [shape: f32[416,128], index: 0, kind: input, shape index: {}]   ;;  %s4058_s1 = inlined_call_operand.vmem [shape: f32[16,16], index: 1, kind: input, shape index: {}]   ;;  %s4059_s2 = inlined_call_operand.vmem [shape: s32[16,2], index: 2, kind: input, shape index: {}]   ;;  %s4060_s3 = inlined_call_operand.hbm [shape: f32[16,32], index: 3, kind: output, shape index: {}]  }
   0x1   :  { %9 = vsyncpa [#allocation4], 0  ;;  %s3691_s12 = smov [#allocation2]   ;;  %s3643_s16 = scalar_lea.hbm %s4057_s0, 6656 }
   0x2   :  { %s15_s13 = sshll.u32 %s3691_s12, 4  ;;  %p3644_p0 = scmp.ne.s32.totalorder %s4057_s0, %s3643_s16  ;;  %s16_s13 = int_to_ptr.vmem [resolvable:$true] %s15_s13 }
   0x3   :  { %p3647_p1 = scmp.lt.u32.totalorder %s3643_s16, %s4057_s0 }
   0x5   :  { %p3649_p2 = pnand %p3647_p1, %p3644_p0 }
   0x7   :  { %3652 = shalt.err (!%p3649_p2)
}
   0x8   :  { %s3653_s21 = scalar_lea.vmem %s16_s13, 6656  ;;  %p3658_p4 = scmp.lt.s32.totalorder %s16_s13, %s16_s13 }
   0x9   :  { %p3654_p3 = scmp.ne.s32.totalorder %s16_s13, %s3653_s21  ;;  %p3659_p5 = scmp.lt.s32.totalorder %s3653_s21, %s3653_s21 }
   0xb   :  { %p3660_p6 = por %p3659_p5, %p3658_p4 }
   0xd   :  { %p3661_p7 = pnand %p3660_p6, %p3654_p3 }
   0xf   :  { %3664 = shalt.err (!%p3661_p7)
}
  0x10   :  { %s3692_s22 = smov 128   ;;  %s3693_s23 = smov 8  }
  0x11   :  { %21 = dma.hbm_to_vmem [thread:$0]  %s4057_s0, 6656, %s16_s13, [#allocation3], %s3692_s22, %s3692_s22, %s3693_s23  }
  0x12   :  { %3687 = dma.done.wait [#allocation3], 6656  }
  0x13   :  { %3688 = vsyncadd [#allocation3], 4294960640  ;;  %v3694_v0 = vmov 0   ;;  %v3695_v1 = vmov 1   ;;  %v29_v2 = vld [vmem:[%s4059_s2] sm:$0xff]  ;;  %v30_v3 = vld [vmem:[%s4059_s2 + $0x8] sm:$0xff]  ;;  %v31_v19 = vlaneseq }
  0x14   :  { %3468 = vset.pattern.permute.xlu0 %v3694_v0  ;;  %3469 = vset.pattern.permute.xlu1 %v3695_v1  ;;  %vm54_vm0 = vcmp.eq.s32.totalorder %v29_v2, 0  ;;  %vm55_vm1 = vcmp.eq.s32.totalorder %v30_v3, 0  ;;  %v43_v4 = vld [vmem:[#allocation2] sm:$0xff]  ;;  %v44_v5 = vld [vmem:[#allocation2 + $0x8] sm:$0xff]  ;;  %v45_v6 = vld [vmem:[#allocation2 + $0x10] sm:$0xff]  ;;  %s3696_s0 = smov 96  }
  0x15   :  { %34 = vperm.xlu0 %3468, %v29_v2   ;;  %v56_v7 = vsel %vm54_vm0, 1, %v3694_v0  ;;  %v3272_v8 = vpack.c.bf16 %v44_v5, %v43_v4  ;;  %v46_v9 = vld [vmem:[#allocation2 + $0x18] sm:$0xff]  ;;  %v47_v11 = vld [vmem:[#allocation2 + $0x20] sm:$0xff]  ;;  %v48_v12 = vld [vmem:[#allocation2 + $0x28] sm:$0xff]  ;;  %v57_v13 = vsel %vm55_vm1, 1, %v3694_v0  ;;  %v32_v20 = vand.u32 127, %v31_v19 }
  0x16   :  { %59 = vperm.xlu1 %3469, %v56_v7   ;;  %v3276_v10 = vpack.c.bf16 %v46_v9, %v45_v6  ;;  %v3752_v14 = vld [vmem:[#allocation2 + $0x190] ss:$0 sm:$0xff]  ;;  %v3280_v15 = vpack.c.bf16 %v48_v12, %v47_v11  ;;  %v50_v17 = vld [vmem:[#allocation2 + $0x38] sm:$0xff]  ;;  %vm76_vm2 = vcmask 523264   ;;  %v3697_v22 = vmov 0.0   ;;  %s3698_s2 = smov 64  }
  0x17   :  { %3273 = vmatprep.subr.bf16.mxu0 %v3272_v8  ;;  %v49_v16 = vld [vmem:[#allocation2 + $0x30] sm:$0xff]  ;;  %v52_v31 = vld [vmem:[#allocation2 + $0x48] sm:$0xff]  ;;  %v51_v32 = vld [vmem:[#allocation2 + $0x40] sm:$0xff]  ;;  %vm168_vm7 = vcmask 261120   ;;  %vm317_vm8 = vcmask 64512   ;;  %s3699_s30 = smov 88  }
  0x18   :  { %3275 = vmatpush3.bf16.msra.mxu0 %v3272_v8  ;;  %v3284_v18 = vpack.c.bf16 %v50_v17, %v49_v16  ;;  %v202_v53 = vld [vmem:[#allocation2 + $0x50] sm:$0xff]  ;;  %v203_v54 = vld [vmem:[#allocation2 + $0x58] sm:$0xff]  ;;  %v204_v55 = vld [vmem:[#allocation2 + $0x60] sm:$0xff]  ;;  %s3700_s4 = smov 80   ;;  %s3701_s5 = smov 72   ;;  %vm690_vm10 = vcmask 130048  }
  0x19   :  { %37 = vperm.xlu0 %3468, %v30_v3   ;;  %3277 = vmatprep.subr.bf16.mxu0 %v3276_v10  ;;  %v3288_v56 = vpack.c.bf16 %v203_v54, %v202_v53  ;;  %v205_v57 = vld [vmem:[#allocation2 + $0x68] sm:$0xff]  ;;  %v2835_v9 = vld [vmem:[#allocation2 + $0x191] ss:$0 sm:$0xff]  ;;  %s3702_s6 = smov 120   ;;  %s3703_s7 = smov 112   ;;  %vm3795_vm9 = vmpackc.low %vm317_vm8, %vm317_vm8  ;;  %vm1155_vm11 = vcmask 195584  }
  0x1a   :  { %62 = vperm.xlu1 %3469, %v57_v13   ;;  %v3292_v58 = vpack.c.bf16 %v205_v57, %v204_v55  ;;  %s3704_s8 = smov 104   ;;  %s3706_s13 = smov 48  }
  0x1b   :  { %3289 = vmatprep.subr.bf16.mxu1 %v3288_v56  ;;  %s3707_s14 = smov 40   ;;  %s3708_s15 = smov 16  }
  0x1c   :  { %3279 = vmatpush3.bf16.msra.mxu0 %v3276_v10  ;;  %3291 = vmatpush3.bf16.msra.mxu1 %v3288_v56  ;;  %s3709_s16 = smov 24   ;;  %s3710_s17 = smov [#allocation5]  }
  0x1d   :  { %71 = vrot.lane.b32.xlu0 %v3752_v14, %s3696_s0  ;;  %3281 = vmatprep.subr.bf16.mxu0 %v3280_v15  ;;  %s2820_s18 = sshll.u32 %s3710_s17, 4  ;;  %s2821_s18 = int_to_ptr.vmem [resolvable:$true] %s2820_s18 }
  0x1e   :  { %3550 = vset.pattern.permute.xlu0 %v3695_v1  ;;  %3293 = vmatprep.subr.bf16.mxu1 %v3292_v58  ;;  %s3665_s19 = scalar_lea.vmem %s2821_s18, 256  ;;  %p3670_p9 = scmp.lt.s32.totalorder %s2821_s18, %s2821_s18 }
  0x1f   :  { %p3666_p8 = scmp.ne.s32.totalorder %s2821_s18, %s3665_s19  ;;  %p3671_p10 = scmp.lt.s32.totalorder %s3665_s19, %s3665_s19 }
  0x20   :  { %3283 = vmatpush3.bf16.msra.mxu0 %v3280_v15  ;;  %3295 = vmatpush3.bf16.msra.mxu1 %v3292_v58 }
  0x21   :  { %3285 = vmatprep.subr.bf16.mxu0 %v3284_v18  ;;  %p3672_p11 = por %p3671_p10, %p3670_p9 }
  0x23   :  { %p3673_p12 = pnand %p3672_p11, %p3666_p8 }
  0x24   :  { %3287 = vmatpush3.bf16.msra.mxu0 %v3284_v18 }
  0x94   :  { %v35_v21 = vpop.permute.xlu0 %34 }
  0x95   :  { %vm39_vm3 = vcmp.eq.s32.totalorder %v32_v20, %v35_v21  ;;  %v60_v24 = vpop.permute.xlu1 %59 }
  0x96   :  { %v41_v23 = vsel %vm39_vm3, 1.0, %v3697_v22  ;;  %vm64_vm5 = vcmp.eq.s32.totalorder %v60_v24, 1 }
  0x97   :  { %3053 = vmatprep.mubr.msk.f32.mxu0 %vm76_vm2, %v41_v23 }
  0x98   :  { %v38_v25 = vpop.permute.xlu0 %37 }
  0x99   :  { %vm40_vm4 = vcmp.eq.s32.totalorder %v32_v20, %v38_v25  ;;  %v63_v27 = vpop.permute.xlu1 %62 }
  0x9a   :  { %v42_v26 = vsel %vm40_vm4, 1.0, %v3697_v22  ;;  %vm65_vm6 = vcmp.eq.s32.totalorder %v63_v27, 1 }
  0x9b   :  { %3054 = vmatmul.mubr.msk.f32.vlgmr.msra.gmra.mrb[0].mxu0 %vm76_vm2, %v42_v26 }
  0x9c   :  { %v72_v28 = vpop.permute.xlu0 %71 }
  0x9d   :  { %v74_v29 = vsel %vm64_vm5, %v3752_v14, %v72_v28  ;;  %v75_v30 = vsel %vm65_vm6, %v3752_v14, %v72_v28 }
  0x9e   :  { %160 = vrot.lane.b32.xlu1 %v74_v29, %s3698_s2  ;;  %162 = vrot.lane.b32.xlu0 %v75_v30, %s3698_s2 }
 0x110   :  { %v163_v36 = vpop.permute.xlu0 %162  ;;  %v161_v39 = vpop.permute.xlu1 %160 }
 0x16e   :  { %v3055_v33 = vpop.f32.mrb[0].mxu0 }
 0x16f   :  { %v155_v34 = vadd.f32 %v3055_v33, %v52_v31  ;;  %v149_v35 = vpop.f32.mrb[1].mxu0 }
 0x170   :  { %v150_v37 = vadd.f32 %v149_v35, %v51_v32 }
 0x171   :  { %v167_v38 = vadd.f32 %v163_v36, %v155_v34 }
 0x172   :  { %v166_v40 = vadd.f32 %v161_v39, %v150_v37  ;;  %v3825_v39 = vld [vmem:[%s4058_s1 + $0x8] sm:$0xff] }
 0x173   :  { %v172_v41 = vsel %vm168_vm7, %v167_v38, 0.0 }
 0x174   :  { %173 = vadd.xlane.f32.xlu0 %v172_v41  ;;  %v169_v42 = vsel %vm168_vm7, %v166_v40, 0.0 }
 0x175   :  { %170 = vadd.xlane.f32.xlu1 %v169_v42  ;;  %v3830_v42 = vld [vmem:[%s4058_s1] sm:$0xff]  ;;  %s3705_s1 = smov 56  }
 0x201   :  { %v174_v43 = vpop.xlane.xlu0 %173 }
 0x202   :  { %v177_v44 = vmul.f32 0.03125, %v174_v43  ;;  %v171_v45 = vpop.xlane.xlu1 %170 }
 0x203   :  { %v176_v46 = vmul.f32 0.03125, %v171_v45 }
 0x204   :  { %v179_v47 = vsub.f32 %v167_v38, %v177_v44 }
 0x205   :  { %v178_v48 = vsub.f32 %v166_v40, %v176_v46 }
 0x206   :  { %v181_v49 = vmul.f32 %v179_v47, %v179_v47 }
 0x207   :  { %v180_v50 = vmul.f32 %v178_v48, %v178_v48 }
 0x208   :  { %v185_v51 = vsel %vm168_vm7, %v181_v49, 0.0 }
 0x209   :  { %186 = vadd.xlane.f32.xlu1 %v185_v51  ;;  %v182_v52 = vsel %vm168_vm7, %v180_v50, 0.0 }
 0x20a   :  { %183 = vadd.xlane.f32.xlu0 %v182_v52 }
 0x296   :  { %v187_v59 = vpop.xlane.xlu1 %186 }
 0x297   :  { %v189_v60 = vmul.f32 0.03125, %v187_v59  ;;  %v184_v61 = vpop.xlane.xlu0 %183 }
 0x298   :  { %v188_v62 = vmul.f32 0.03125, %v184_v61 }
 0x299   :  { %v191_v63 = vadd.f32 1e-12, %v189_v60 }
 0x29a   :  { %v190_v0 = vadd.f32 1e-12, %v188_v62 }
 0x29b   :  { %3551 = vrsqrt.f32 %v191_v63 }
 0x29c   :  { %3553 = vrsqrt.f32 %v190_v0 }
 0x2a5   :  { %v3552_v1 = vpop.eup %3551 }
 0x2a6   :  { %v3554_v2 = vpop.eup %3553  ;;  %v195_v3 = vmul.f32 %v3552_v1, %v179_v47 }
 0x2a7   :  { %v194_v4 = vmul.f32 %v3554_v2, %v178_v48 }
 0x2a8   :  { %v197_v5 = vmul.f32 %v3752_v14, %v195_v3 }
 0x2a9   :  { %v196_v6 = vmul.f32 %v3752_v14, %v194_v4 }
 0x2aa   :  { %v3770_v8 = vadd.f32 %v197_v5, %v72_v28 }
 0x2ab   :  { %v3768_v7 = vadd.f32 %v196_v6, %v72_v28 }
 0x2ad   :  { %3064 = vmatprep.mubr.msk.f32.mxu1 %vm168_vm7, %v3768_v7 }
 0x2ae   :  { %3065 = vmatmul.mubr.msk.f32.vlgmr.msra.gmra.mrb[0].mxu1 %vm168_vm7, %v3770_v8 }
 0x381   :  { %v3066_v10 = vpop.f32.mrb[0].mxu1 }
 0x382   :  { %v308_v11 = vadd.f32 %v3066_v10, %v2835_v9  ;;  %v302_v12 = vpop.f32.mrb[1].mxu1 }
 0x383   :  { %v303_v13 = vadd.f32 %v2835_v9, %v302_v12 }
 0x385   :  { %3071 = vmatprep.mubr.msk.f32.mxu1 %vm317_vm8, %v303_v13  ;;  %v3777_v15 = vpack.i.bf16 %v308_v11, %v303_v13 }
 0x387   :  { %3476 = vrot.lane.b32.xlu1 %v3777_v15, %s3699_s30  ;;  %3471 = vrot.lane.b32.xlu0 %v3777_v15, %s3696_s0 }
 0x38b   :  { %3481 = vrot.lane.b32.xlu1 %v3777_v15, %s3700_s4  ;;  %3486 = vrot.lane.b32.xlu0 %v3777_v15, %s3701_s5 }
 0x38f   :  { %401 = vrot.lane.b32.xlu1 %v303_v13, %s3702_s6  ;;  %403 = vrot.lane.b32.xlu0 %v308_v11, %s3702_s6 }
 0x393   :  { %492 = vrot.lane.b32.xlu1 %v303_v13, %s3703_s7  ;;  %494 = vrot.lane.b32.xlu0 %v308_v11, %s3703_s7 }
 0x397   :  { %583 = vrot.lane.b32.xlu1 %v303_v13, %s3704_s8  ;;  %585 = vrot.lane.b32.xlu0 %v308_v11, %s3704_s8 }
 0x3f9   :  { %v3477_v14 = vpop.permute.xlu1 %3476  ;;  %v3472_v16 = vpop.permute.xlu0 %3471 }
 0x3fa   :  { %v3479_v17 = vunpack.i.h.bf16 %v3477_v14  ;;  %v3478_v18 = vunpack.i.l.bf16 %v3477_v14  ;;  %v3474_v19 = vunpack.i.h.bf16 %v3472_v16  ;;  %v3473_v20 = vunpack.i.l.bf16 %v3472_v16 }
 0x3fc   :  { %v3296_v22 = vpack.c.bf16 %v3474_v19, %v3473_v20  ;;  %v3302_v25 = vpack.c.bf16 %v3479_v17, %v3478_v18 }
 0x3fd   :  { %v3482_v23 = vpop.permute.xlu1 %3481  ;;  %v3487_v24 = vpop.permute.xlu0 %3486 }
 0x3fe   :  { %v3489_v26 = vunpack.i.h.bf16 %v3487_v24  ;;  %v3488_v27 = vunpack.i.l.bf16 %v3487_v24  ;;  %3298 = vmatprep.subr.msk.bf16.mxu1 %vm3795_vm9, %v3296_v22  ;;  %v3484_v31 = vunpack.i.h.bf16 %v3482_v23  ;;  %v3483_v32 = vunpack.i.l.bf16 %v3482_v23 }
 0x3ff   :  { %3301 = vmatpush3.bf16.xpose.msk.msra.mxu1 %vm3795_vm9, %v3296_v22 }
 0x400   :  { %v3314_v28 = vpack.c.bf16 %v3489_v26, %v3488_v27  ;;  %3304 = vmatprep.subr.msk.bf16.mxu1 %vm3795_vm9, %v3302_v25  ;;  %v3308_v35 = vpack.c.bf16 %v3484_v31, %v3483_v32 }
 0x401   :  { %v402_v29 = vpop.permute.xlu1 %401  ;;  %v404_v30 = vpop.permute.xlu0 %403 }
 0x402   :  { %3316 = vmatprep.subr.msk.bf16.mxu0 %vm3795_vm9, %v3314_v28 }
 0x403   :  { %3319 = vmatpush3.bf16.xpose.msk.msra.mxu0 %vm3795_vm9, %v3314_v28 }
 0x405   :  { %v493_v33 = vpop.permute.xlu1 %492  ;;  %v495_v34 = vpop.permute.xlu0 %494 }
 0x406   :  { %3072 = vmatmul.mubr.msk.f32.vlgmr.msra.gmra.mrb[2].mxu1 %vm317_vm8, %v308_v11 }
 0x407   :  { %3307 = vmatpush3.bf16.xpose.msk.msra.mxu1 %vm3795_vm9, %v3302_v25  ;;  %3078 = vmatprep.mubr.msk.f32.mxu1 %vm317_vm8, %v402_v29 }
 0x408   :  { %3310 = vmatprep.subr.msk.bf16.mxu1 %vm3795_vm9, %v3308_v35 }
 0x409   :  { %v584_v36 = vpop.permute.xlu1 %583  ;;  %v586_v37 = vpop.permute.xlu0 %585 }
 0x40a   :  { %3092 = vmatprep.mubr.msk.f32.mxu0 %vm317_vm8, %v584_v36 }
 0x40b   :  { %3093 = vmatmul.mubr.msk.f32.vlgmr.msra.gmra.mrb[2].mxu0 %vm317_vm8, %v586_v37 }
 0x40e   :  { %3079 = vmatmul.mubr.msk.f32.vlgmr.msra.gmra.mrb[4].mxu1 %vm317_vm8, %v404_v30 }
 0x40f   :  { %3313 = vmatpush3.bf16.xpose.msk.msra.mxu1 %vm3795_vm9, %v3308_v35  ;;  %3085 = vmatprep.mubr.msk.f32.mxu1 %vm317_vm8, %v493_v33 }
 0x416   :  { %3086 = vmatmul.mubr.msk.f32.vlgmr.msra.gmra.mrb[6].mxu1 %vm317_vm8, %v495_v34 }
 0x4d9   :  { %v3073_v38 = vpop.f32.mrb[2].mxu1 }
 0x4da   :  { %v675_v40 = vmul.f32 0.35355338, %v3073_v38  ;;  %v392_v41 = vpop.f32.mrb[3].mxu1 }
 0x4db   :  { %v674_v43 = vmul.f32 0.35355338, %v392_v41 }
 0x4dc   :  { %v683_v44 = vadd.f32 %v675_v40, %v3825_v39 }
 0x4dd   :  { %v682_v45 = vadd.f32 %v674_v43, %v3830_v42 }
 0x4de   :  { %v3094_v46 = vpop.f32.mrb[2].mxu0  ;;  %v694_v47 = vsel %vm690_vm10, %v683_v44, -inf }
 0x4df   :  { %v665_v48 = vpop.f32.mrb[3].mxu0  ;;  %695 = vmax.xlane.f32.xlu0 %v694_v47  ;;  %v691_v49 = vsel %vm690_vm10, %v682_v45, -inf  ;;  %v681_v59 = vmul.f32 0.35355338, %v3094_v46 }
 0x4e0   :  { %692 = vmax.xlane.f32.xlu1 %v691_v49  ;;  %v680_v62 = vmul.f32 0.35355338, %v665_v48 }
 0x4e1   :  { %v3080_v50 = vpop.f32.mrb[4].mxu1  ;;  %v689_v3 = vadd.f32 %v681_v59, %v3825_v39 }
 0x4e2   :  { %v677_v51 = vmul.f32 0.35355338, %v3080_v50  ;;  %v483_v52 = vpop.f32.mrb[5].mxu1  ;;  %v688_v5 = vadd.f32 %v680_v62, %v3830_v42 }
 0x4e3   :  { %v676_v53 = vmul.f32 0.35355338, %v483_v52  ;;  %v712_v6 = vsel %vm690_vm10, %v689_v3, -inf }
 0x4e4   :  { %v685_v54 = vadd.f32 %v677_v51, %v3825_v39  ;;  %v709_v9 = vsel %vm690_vm10, %v688_v5, -inf }
 0x4e5   :  { %v684_v55 = vadd.f32 %v676_v53, %v3830_v42 }
 0x4e6   :  { %v700_v56 = vsel %vm690_vm10, %v685_v54, -inf }
 0x4e7   :  { %701 = vmax.xlane.f32.xlu1 %v700_v56  ;;  %v697_v57 = vsel %vm690_vm10, %v684_v55, -inf }
 0x4e8   :  { %698 = vmax.xlane.f32.xlu0 %v697_v57 }
 0x4e9   :  { %v3087_v58 = vpop.f32.mrb[6].mxu1 }
 0x4ea   :  { %v679_v60 = vmul.f32 0.35355338, %v3087_v58  ;;  %v574_v61 = vpop.f32.mrb[7].mxu1 }
 0x4eb   :  { %v678_v63 = vmul.f32 0.35355338, %v574_v61 }
 0x4ec   :  { %v687_v0 = vadd.f32 %v679_v60, %v3825_v39 }
 0x4ed   :  { %v686_v1 = vadd.f32 %v678_v63, %v3830_v42 }
 0x4ee   :  { %v706_v2 = vsel %vm690_vm10, %v687_v0, -inf }
 0x4ef   :  { %707 = vmax.xlane.f32.xlu1 %v706_v2  ;;  %v703_v4 = vsel %vm690_vm10, %v686_v1, -inf }
 0x4f0   :  { %704 = vmax.xlane.f32.xlu0 %v703_v4 }
 0x4f3   :  { %713 = vmax.xlane.f32.xlu1 %v712_v6 }
 0x4f4   :  { %710 = vmax.xlane.f32.xlu0 %v709_v9 }
 0x504   :  { %3496 = vrot.lane.b32.xlu1 %v3777_v15, %s3705_s1 }
 0x50a   :  { %3491 = vrot.lane.b32.xlu0 %v3777_v15, %s3698_s2 }
 0x56c   :  { %v696_v10 = vpop.xlane.xlu0 %695 }
 0x56d   :  { %v716_v11 = vsub.f32 %v683_v44, %v696_v10  ;;  %v693_v12 = vpop.xlane.xlu1 %692 }
 0x56e   :  { %v715_v13 = vsub.f32 %v682_v45, %v693_v12 }
 0x56f   :  { %v725_v14 = vmul.f32 1.442695, %v716_v11 }
 0x570   :  { %v723_v16 = vmul.f32 1.442695, %v715_v13 }
 0x571   :  { %3555 = vpow2.f32 %v725_v14 }
 0x572   :  { %3557 = vpow2.f32 %v723_v16 }
 0x574   :  { %v702_v17 = vpop.xlane.xlu1 %701 }
 0x575   :  { %v699_v18 = vpop.xlane.xlu0 %698  ;;  %v718_v26 = vsub.f32 %v685_v54, %v702_v17 }
 0x576   :  { %v717_v27 = vsub.f32 %v684_v55, %v699_v18 }
 0x577   :  { %v729_v32 = vmul.f32 1.442695, %v718_v26 }
 0x578   :  { %v727_v35 = vmul.f32 1.442695, %v717_v27 }
 0x57b   :  { %v3852_v19 = vpop.eup %3555 }
 0x57c   :  { %v3854_v20 = vpop.eup %3557  ;;  %v708_v22 = vpop.xlane.xlu1 %707  ;;  %v742_v23 = vsel %vm690_vm10, %v3852_v19, 0.0 }
 0x57d   :  { %743 = vadd.xlane.f32.xlu1 %v742_v23  ;;  %v705_v24 = vpop.xlane.xlu0 %704  ;;  %v739_v25 = vsel %vm690_vm10, %v3854_v20, 0.0  ;;  %v720_v33 = vsub.f32 %v687_v0, %v708_v22 }
 0x57e   :  { %740 = vadd.xlane.f32.xlu0 %v739_v25  ;;  %v719_v36 = vsub.f32 %v686_v1, %v705_v24 }
 0x57f   :  { %v733_v46 = vmul.f32 1.442695, %v720_v33 }
 0x580   :  { %v714_v28 = vpop.xlane.xlu1 %713  ;;  %v731_v47 = vmul.f32 1.442695, %v719_v36  ;;  %v207_v36 = vld [vmem:[#allocation2 + $0x78] sm:$0xff] }
 0x581   :  { %v722_v29 = vsub.f32 %v689_v3, %v714_v28  ;;  %v711_v30 = vpop.xlane.xlu0 %710 }
 0x582   :  { %v721_v31 = vsub.f32 %v688_v5, %v711_v30 }
 0x583   :  { %v737_v34 = vmul.f32 1.442695, %v722_v29 }
 0x584   :  { %v735_v37 = vmul.f32 1.442695, %v721_v31  ;;  %v3497_v38 = vpop.permute.xlu1 %3496 }
 0x585   :  { %3559 = vpow2.f32 %v737_v34  ;;  %v3499_v40 = vunpack.i.h.bf16 %v3497_v38  ;;  %v3492_v41 = vpop.permute.xlu0 %3491  ;;  %v3498_v43 = vunpack.i.l.bf16 %v3497_v38  ;;  %v208_v38 = vld [vmem:[#allocation2 + $0x80] sm:$0xff] }
 0x586   :  { %3561 = vpow2.f32 %v735_v37  ;;  %v3494_v44 = vunpack.i.h.bf16 %v3492_v41  ;;  %v3493_v45 = vunpack.i.l.bf16 %v3492_v41 }
 0x587   :  { %3563 = vpow2.f32 %v729_v32  ;;  %v3324_v49 = vpack.c.bf16 %v3499_v40, %v3498_v43  ;;  %v209_v40 = vld [vmem:[#allocation2 + $0x88] sm:$0xff] }
 0x588   :  { %3565 = vpow2.f32 %v727_v35  ;;  %v3320_v48 = vpack.c.bf16 %v3494_v44, %v3493_v45  ;;  %v206_v35 = vld [vmem:[#allocation2 + $0x70] sm:$0xff]  ;;  %v3340_v41 = vpack.c.bf16 %v209_v40, %v208_v38 }
 0x589   :  { %3567 = vpow2.f32 %v733_v46  ;;  %v3336_v37 = vpack.c.bf16 %v207_v36, %v206_v35  ;;  %v214_v40 = vld [vmem:[#allocation2 + $0xb0] sm:$0xff] }
 0x58a   :  { %3321 = vmatprep.subr.bf16.mxu1 %v3320_v48  ;;  %3569 = vpow2.f32 %v731_v47 }
 0x58b   :  { %3323 = vmatpush3.bf16.msra.mxu1 %v3320_v48 }
 0x58c   :  { %3325 = vmatprep.subr.bf16.mxu1 %v3324_v49 }
 0x58f   :  { %v3860_v50 = vpop.eup %3559 }
 0x590   :  { %v3862_v51 = vpop.eup %3561  ;;  %v760_v52 = vsel %vm690_vm10, %v3860_v50, 0.0 }
 0x591   :  { %v3564_v53 = vpop.eup %3563  ;;  %761 = vadd.xlane.f32.xlu1 %v760_v52  ;;  %v757_v54 = vsel %vm690_vm10, %v3862_v51, 0.0 }
 0x592   :  { %v3566_v55 = vpop.eup %3565  ;;  %758 = vadd.xlane.f32.xlu0 %v757_v54  ;;  %v748_v56 = vsel %vm690_vm10, %v3564_v53, 0.0 }
 0x593   :  { %v3568_v57 = vpop.eup %3567  ;;  %v745_v58 = vsel %vm690_vm10, %v3566_v55, 0.0 }
 0x594   :  { %v3570_v59 = vpop.eup %3569  ;;  %v754_v60 = vsel %vm690_vm10, %v3568_v57, 0.0 }
 0x595   :  { %749 = vadd.xlane.f32.xlu1 %v748_v56  ;;  %v751_v61 = vsel %vm690_vm10, %v3570_v59, 0.0 }
 0x596   :  { %746 = vadd.xlane.f32.xlu0 %v745_v58 }
 0x599   :  { %755 = vadd.xlane.f32.xlu1 %v754_v60 }
 0x59a   :  { %752 = vadd.xlane.f32.xlu0 %v751_v61  ;;  %v2862_v61 = vld [vmem:[#allocation2 + $0x192] ss:$0 sm:$0xff] }
 0x5aa   :  { %3501 = vrot.lane.b32.xlu1 %v3777_v15, %s3706_s13 }
 0x5b0   :  { %3506 = vrot.lane.b32.xlu0 %v3777_v15, %s3707_s14 }
 0x60a   :  { %v744_v62 = vpop.xlane.xlu1 %743 }
 0x60b   :  { %3571 = vrcp.f32 %v744_v62  ;;  %v741_v63 = vpop.xlane.xlu0 %740 }
 0x60c   :  { %3573 = vrcp.f32 %v741_v63 }
 0x615   :  { %v3572_v0 = vpop.eup %3571 }
 0x616   :  { %v3574_v1 = vpop.eup %3573  ;;  %v766_v3 = vmul.f32 %v3572_v0, %v3852_v19 }
 0x617   :  { %v764_v2 = vmul.f32 %v3574_v1, %v3854_v20 }
 0x619   :  { %3099 = vmatprep.mubr.msk.f32.mxu1 %vm690_vm10, %v764_v2 }
 0x61a   :  { %3100 = vmatmul.mubr.msk.f32.vlgmr.msra.gmra.mrb[8].mxu1 %vm690_vm10, %v766_v3 }
 0x61b   :  { %3327 = vmatpush3.bf16.msra.mxu1 %v3324_v49 }
 0x61e   :  { %v762_v4 = vpop.xlane.xlu1 %761 }
 0x61f   :  { %v759_v5 = vpop.xlane.xlu0 %758 }
 0x620   :  { %3575 = vrcp.f32 %v759_v5 }
 0x622   :  { %v750_v6 = vpop.xlane.xlu1 %749 }
 0x623   :  { %3577 = vrcp.f32 %v750_v6  ;;  %v747_v15 = vpop.xlane.xlu0 %746 }
 0x624   :  { %3579 = vrcp.f32 %v747_v15 }
 0x625   :  { %3581 = vrcp.f32 %v762_v4 }
 0x626   :  { %v756_v9 = vpop.xlane.xlu1 %755 }
 0x627   :  { %3583 = vrcp.f32 %v756_v9  ;;  %v753_v10 = vpop.xlane.xlu0 %752 }
 0x628   :  { %3585 = vrcp.f32 %v753_v10 }
 0x62a   :  { %v3502_v11 = vpop.permute.xlu1 %3501  ;;  %v3576_v16 = vpop.eup %3575 }
 0x62b   :  { %v3504_v12 = vunpack.i.h.bf16 %v3502_v11  ;;  %v3503_v13 = vunpack.i.l.bf16 %v3502_v11  ;;  %v3507_v14 = vpop.permute.xlu0 %3506  ;;  %v776_v28 = vmul.f32 %v3576_v16, %v3862_v51 }
 0x62c   :  { %v3509_v17 = vunpack.i.h.bf16 %v3507_v14  ;;  %v3508_v18 = vunpack.i.l.bf16 %v3507_v14 }
 0x62d   :  { %v3578_v19 = vpop.eup %3577  ;;  %v3328_v20 = vpack.c.bf16 %v3504_v12, %v3503_v13 }
 0x62e   :  { %v3580_v22 = vpop.eup %3579  ;;  %v3332_v23 = vpack.c.bf16 %v3509_v17, %v3508_v18  ;;  %v770_v26 = vmul.f32 %v3578_v19, %v3564_v53  ;;  %v211_v17 = vld [vmem:[#allocation2 + $0x98] sm:$0xff]  ;;  %v212_v19 = vld [vmem:[#allocation2 + $0xa0] sm:$0xff] }
 0x62f   :  { %3329 = vmatprep.subr.bf16.mxu0 %v3328_v20  ;;  %v768_v24 = vmul.f32 %v3580_v22, %v3566_v55  ;;  %v3582_v25 = vpop.eup %3581 }
 0x630   :  { %3331 = vmatpush3.bf16.msra.mxu0 %v3328_v20  ;;  %3333 = vmatprep.subr.bf16.mxu1 %v3332_v23  ;;  %v778_v31 = vmul.f32 %v3582_v25, %v3860_v50  ;;  %v213_v20 = vld [vmem:[#allocation2 + $0xa8] sm:$0xff] }
 0x631   :  { %v3584_v27 = vpop.eup %3583  ;;  %3106 = vmatprep.mubr.msk.f32.mxu1 %vm690_vm10, %v768_v24  ;;  %3337 = vmatprep.subr.bf16.mxu0 %v3336_v37  ;;  %v3348_v22 = vpack.c.bf16 %v213_v20, %v212_v19 }
 0x632   :  { %v3586_v29 = vpop.eup %3585  ;;  %3107 = vmatmul.mubr.msk.f32.vlgmr.msra.gmra.mrb[10].mxu1 %vm690_vm10, %v770_v26  ;;  %v774_v32 = vmul.f32 %v3584_v27, %v3568_v57 }
 0x633   :  { %3335 = vmatpush3.bf16.msra.mxu1 %v3332_v23  ;;  %3120 = vmatprep.mubr.msk.f32.mxu1 %vm690_vm10, %v776_v28  ;;  %v772_v30 = vmul.f32 %v3586_v29, %v3570_v59 }
 0x635   :  { %3113 = vmatprep.mubr.msk.f32.mxu0 %vm690_vm10, %v772_v30 }
 0x636   :  { %3114 = vmatmul.mubr.msk.f32.vlgmr.msra.gmra.mrb[4].mxu0 %vm690_vm10, %v774_v32  ;;  %3121 = vmatmul.mubr.msk.f32.vlgmr.msra.gmra.mrb[12].mxu1 %vm690_vm10, %v778_v31 }
 0x637   :  { %3339 = vmatpush3.bf16.msra.mxu0 %v3336_v37 }
 0x638   :  { %3341 = vmatprep.subr.bf16.mxu0 %v3340_v41 }
 0x63b   :  { %3343 = vmatpush3.bf16.msra.mxu0 %v3340_v41  ;;  %v215_v41 = vld [vmem:[#allocation2 + $0xb8] sm:$0xff] }
 0x6ed   :  { %v3101_v33 = vpop.f32.mrb[8].mxu1 }
 0x6ee   :  { %v857_v34 = vpop.f32.mrb[9].mxu1 }
 0x705   :  { %v3108_v43 = vpop.f32.mrb[10].mxu1 }
 0x706   :  { %1131 = vrot.lane.b32.xlu0 %v3108_v43, %s3693_s23  ;;  %v944_v44 = vpop.f32.mrb[11].mxu1  ;;  %v3352_v43 = vpack.c.bf16 %v215_v41, %v214_v40 }
 0x707   :  { %1129 = vrot.lane.b32.xlu1 %v944_v44, %s3693_s23  ;;  %v216_v44 = vld [vmem:[#allocation2 + $0xc0] sm:$0xff] }
 0x708   :  { %3353 = vmatprep.subr.bf16.mxu0 %v3352_v43 }
 0x709   :  { %v3115_v45 = vpop.f32.mrb[4].mxu0  ;;  %v3122_v46 = vpop.f32.mrb[12].mxu1 }
 0x70a   :  { %v1031_v47 = vpop.f32.mrb[5].mxu0  ;;  %1139 = vrot.lane.b32.xlu0 %v3115_v45, %s3708_s15  ;;  %v1118_v48 = vpop.f32.mrb[13].mxu1  ;;  %v217_v45 = vld [vmem:[#allocation2 + $0xc8] sm:$0xff] }
 0x70b   :  { %1137 = vrot.lane.b32.xlu1 %v1031_v47, %s3708_s15  ;;  %v218_v47 = vld [vmem:[#allocation2 + $0xd0] sm:$0xff] }
 0x70e   :  { %1147 = vrot.lane.b32.xlu0 %v3122_v46, %s3709_s16  ;;  %v3356_v46 = vpack.c.bf16 %v217_v45, %v216_v44 }
 0x70f   :  { %1145 = vrot.lane.b32.xlu1 %v1118_v48, %s3709_s16  ;;  %v219_v48 = vld [vmem:[#allocation2 + $0xd8] sm:$0xff] }
 0x778   :  { %v1132_v49 = vpop.permute.xlu0 %1131 }
 0x779   :  { %v1130_v50 = vpop.permute.xlu1 %1129  ;;  %v1152_v55 = vsel %vm317_vm8, %v3101_v33, %v1132_v49  ;;  %v3360_v49 = vpack.c.bf16 %v219_v48, %v218_v47 }
 0x77a   :  { %v1151_v53 = vsel %vm317_vm8, %v857_v34, %v1130_v50  ;;  %v220_v50 = vld [vmem:[#allocation2 + $0xe0] sm:$0xff] }
 0x77c   :  { %v1140_v51 = vpop.permute.xlu0 %1139 }
 0x77d   :  { %v1138_v52 = vpop.permute.xlu1 %1137  ;;  %v1154_v58 = vsel %vm690_vm10, %v1152_v55, %v1140_v51  ;;  %v221_v51 = vld [vmem:[#allocation2 + $0xe8] sm:$0xff] }
 0x77e   :  { %v1153_v56 = vsel %vm690_vm10, %v1151_v53, %v1138_v52  ;;  %v3364_v52 = vpack.c.bf16 %v221_v51, %v220_v50  ;;  %v2865_v53 = vld [vmem:[#allocation2 + $0x193] ss:$0 sm:$0xff] }
 0x780   :  { %v1148_v54 = vpop.permute.xlu0 %1147 }
 0x781   :  { %v1146_v57 = vpop.permute.xlu1 %1145  ;;  %v1157_v60 = vsel %vm1155_vm11, %v1154_v58, %v1148_v54 }
 0x782   :  { %v1156_v59 = vsel %vm1155_vm11, %v1153_v56, %v1146_v57 }
 0x783   :  { %3131 = vmatprep.mubr.msk.f32.mxu0 %vm168_vm7, %v1156_v59 }
 0x784   :  { %3132 = vmatmul.mubr.msk.f32.vlgmr.msra.gmra.mrb[6].mxu0 %vm168_vm7, %v1157_v60 }
 0x785   :  { %3355 = vmatpush3.bf16.msra.mxu0 %v3352_v43 }
 0x786   :  { %3357 = vmatprep.subr.bf16.mxu0 %v3356_v46 }
 0x789   :  { %3359 = vmatpush3.bf16.msra.mxu0 %v3356_v46 }
 0x78a   :  { %3361 = vmatprep.subr.bf16.mxu0 %v3360_v49 }
 0x78d   :  { %3363 = vmatpush3.bf16.msra.mxu0 %v3360_v49 }
 0x78e   :  { %3365 = vmatprep.subr.bf16.mxu0 %v3364_v52 }
 0x791   :  { %3367 = vmatpush3.bf16.msra.mxu0 %v3364_v52 }
 0x857   :  { %v3133_v62 = vpop.f32.mrb[6].mxu0 }
 0x858   :  { %v1240_v63 = vadd.f32 %v3133_v62, %v2862_v61  ;;  %v1234_v0 = vpop.f32.mrb[7].mxu0 }
 0x859   :  { %v1235_v1 = vadd.f32 %v2862_v61, %v1234_v0 }
 0x85a   :  { %v1244_v2 = vadd.f32 %v1240_v63, %v3770_v8 }
 0x85b   :  { %v1243_v3 = vadd.f32 %v1235_v1, %v3768_v7  ;;  %v210_v7 = vld [vmem:[#allocation2 + $0x90] sm:$0xff] }
 0x85c   :  { %v1248_v4 = vsel %vm168_vm7, %v1244_v2, 0.0  ;;  %v3344_v18 = vpack.c.bf16 %v211_v17, %v210_v7 }
 0x85d   :  { %1249 = vadd.xlane.f32.xlu0 %v1248_v4  ;;  %v1245_v5 = vsel %vm168_vm7, %v1243_v3, 0.0 }
 0x85e   :  { %1246 = vadd.xlane.f32.xlu1 %v1245_v5  ;;  %3345 = vmatprep.subr.bf16.mxu1 %v3344_v18 }
 0x85f   :  { %3347 = vmatpush3.bf16.msra.mxu1 %v3344_v18 }
 0x860   :  { %3349 = vmatprep.subr.bf16.mxu1 %v3348_v22 }
 0x863   :  { %3351 = vmatpush3.bf16.msra.mxu1 %v3348_v22 }
 0x8ea   :  { %v1250_v6 = vpop.xlane.xlu0 %1249 }
 0x8eb   :  { %v1252_v15 = vmul.f32 0.03125, %v1250_v6  ;;  %v1247_v9 = vpop.xlane.xlu1 %1246 }
 0x8ec   :  { %v1251_v10 = vmul.f32 0.03125, %v1247_v9 }
 0x8ed   :  { %v1254_v11 = vsub.f32 %v1244_v2, %v1252_v15 }
 0x8ee   :  { %v1253_v12 = vsub.f32 %v1243_v3, %v1251_v10 }
 0x8ef   :  { %v1256_v13 = vmul.f32 %v1254_v11, %v1254_v11 }
 0x8f0   :  { %v1255_v14 = vmul.f32 %v1253_v12, %v1253_v12 }
 0x8f1   :  { %v1260_v16 = vsel %vm168_vm7, %v1256_v13, 0.0  ;;  %v2868_v13 = vld [vmem:[#allocation2 + $0x194] ss:$0 sm:$0xff] }
 0x8f2   :  { %1261 = vadd.xlane.f32.xlu1 %v1260_v16  ;;  %v1257_v8 = vsel %vm168_vm7, %v1255_v14, 0.0 }
 0x8f3   :  { %1258 = vadd.xlane.f32.xlu0 %v1257_v8 }
 0x903   :  { %1277 = vrot.lane.b32.xlu1 %v2862_v61, %s3698_s2 }
 0x909   :  { %1272 = vrot.lane.b32.xlu0 %v2862_v61, %s3696_s0 }
 0x97f   :  { %v1262_v23 = vpop.xlane.xlu1 %1261 }
 0x980   :  { %v1264_v24 = vmul.f32 0.03125, %v1262_v23  ;;  %v1259_v25 = vpop.xlane.xlu0 %1258 }
 0x981   :  { %v1263_v26 = vmul.f32 0.03125, %v1259_v25 }
 0x982   :  { %v1266_v27 = vadd.f32 1e-12, %v1264_v24 }
 0x983   :  { %v1265_v28 = vadd.f32 1e-12, %v1263_v26  ;;  %v1278_v35 = vpop.permute.xlu1 %1277 }
 0x984   :  { %3587 = vrsqrt.f32 %v1266_v27  ;;  %v1273_v30 = vpop.permute.xlu0 %1272 }
 0x985   :  { %3589 = vrsqrt.f32 %v1265_v28 }
 0x98e   :  { %v3588_v29 = vpop.eup %3587 }
 0x98f   :  { %v3590_v31 = vpop.eup %3589  ;;  %v1270_v32 = vmul.f32 %v3588_v29, %v1254_v11 }
 0x990   :  { %v1269_v33 = vmul.f32 %v3590_v31, %v1253_v12 }
 0x991   :  { %v1276_v34 = vmul.f32 %v1273_v30, %v1270_v32  ;;  %v1509_v32 = vld [vmem:[#allocation2 + $0xf0] sm:$0xff] }
 0x992   :  { %v1275_v36 = vmul.f32 %v1273_v30, %v1269_v33  ;;  %v1510_v33 = vld [vmem:[#allocation2 + $0xf8] sm:$0xff] }
 0x993   :  { %v1281_v38 = vadd.f32 %v1278_v35, %v1276_v34  ;;  %v3368_v34 = vpack.c.bf16 %v1510_v33, %v1509_v32 }
 0x994   :  { %v1280_v37 = vadd.f32 %v1278_v35, %v1275_v36  ;;  %v1511_v35 = vld [vmem:[#allocation2 + $0x100] sm:$0xff]  ;;  %v1512_v36 = vld [vmem:[#allocation2 + $0x108] sm:$0xff] }
 0x995   :  { %3369 = vmatprep.subr.bf16.mxu1 %v3368_v34 }
 0x996   :  { %3142 = vmatprep.mubr.msk.f32.mxu1 %vm168_vm7, %v1280_v37 }
 0x997   :  { %3143 = vmatmul.mubr.msk.f32.vlgmr.msra.gmra.mrb[14].mxu1 %vm168_vm7, %v1281_v38 }
 0x998   :  { %3371 = vmatpush3.bf16.msra.mxu1 %v3368_v34 }
 0xa6a   :  { %v3144_v54 = vpop.f32.mrb[14].mxu1 }
 0xa6b   :  { %v1364_v55 = vadd.f32 %v3144_v54, %v2865_v53  ;;  %v1358_v56 = vpop.f32.mrb[15].mxu1 }
 0xa6c   :  { %v1359_v57 = vadd.f32 %v2865_v53, %v1358_v56  ;;  %v2871_v56 = vld [vmem:[#allocation2 + $0x195] ss:$0 sm:$0xff] }
 0xa6d   :  { %v1370_v58 = vmul.f32 0.044715, %v1364_v55  ;;  %v1368_v10 = vmul.f32 0.5, %v1364_v55 }
 0xa6e   :  { %v1369_v59 = vmul.f32 0.044715, %v1359_v57  ;;  %v1367_v15 = vmul.f32 0.5, %v1359_v57 }
 0xa6f   :  { %v1372_v60 = vmul.f32 %v1370_v58, %v1364_v55 }
 0xa70   :  { %v1371_v61 = vmul.f32 %v1369_v59, %v1359_v57 }
 0xa71   :  { %v1374_v62 = vmul.f32 %v1372_v60, %v1364_v55 }
 0xa72   :  { %v1373_v63 = vmul.f32 %v1371_v61, %v1359_v57 }
 0xa73   :  { %v1376_v0 = vadd.f32 %v1374_v62, %v1364_v55 }
 0xa74   :  { %v1375_v1 = vadd.f32 %v1373_v63, %v1359_v57 }
 0xa75   :  { %v1378_v2 = vmul.f32 0.7978846, %v1376_v0 }
 0xa76   :  { %v1377_v3 = vmul.f32 0.7978846, %v1375_v1 }
 0xa77   :  { %3591 = vtanh.f32 %v1378_v2 }
 0xa78   :  { %3593 = vtanh.f32 %v1377_v3 }
 0xa81   :  { %v3592_v4 = vpop.eup %3591 }
 0xa82   :  { %v3594_v5 = vpop.eup %3593  ;;  %v1382_v6 = vadd.f32 1.0, %v3592_v4 }
 0xa83   :  { %v1381_v9 = vadd.f32 1.0, %v3594_v5 }
 0xa84   :  { %v1384_v12 = vmul.f32 %v1382_v6, %v1368_v10 }
 0xa85   :  { %v1383_v11 = vmul.f32 %v1381_v9, %v1367_v15 }
 0xa87   :  { %3161 = vmatprep.mubr.msk.f32.mxu0 %vm76_vm2, %v1383_v11 }
 0xa88   :  { %3162 = vmatmul.mubr.msk.f32.vlgmr.msra.gmra.mrb[8].mxu0 %vm76_vm2, %v1384_v12 }
 0xb5b   :  { %v3163_v14 = vpop.f32.mrb[8].mxu0 }
 0xb5c   :  { %v1467_v16 = vadd.f32 %v3163_v14, %v2868_v13  ;;  %v1461_v8 = vpop.f32.mrb[9].mxu0 }
 0xb5d   :  { %v1462_v7 = vadd.f32 %v2868_v13, %v1461_v8 }
 0xb5e   :  { %v1471_v17 = vadd.f32 %v1467_v16, %v1281_v38 }
 0xb5f   :  { %v1470_v18 = vadd.f32 %v1462_v7, %v1280_v37  ;;  %v3372_v37 = vpack.c.bf16 %v1512_v36, %v1511_v35 }
 0xb60   :  { %v1475_v19 = vsel %vm168_vm7, %v1471_v17, 0.0 }
 0xb61   :  { %1476 = vadd.xlane.f32.xlu0 %v1475_v19  ;;  %v1472_v20 = vsel %vm168_vm7, %v1470_v18, 0.0  ;;  %3373 = vmatprep.subr.bf16.mxu1 %v3372_v37 }
 0xb62   :  { %1473 = vadd.xlane.f32.xlu1 %v1472_v20  ;;  %3375 = vmatpush3.bf16.msra.mxu1 %v3372_v37 }
 0xbee   :  { %v1477_v22 = vpop.xlane.xlu0 %1476 }
 0xbef   :  { %v1479_v23 = vmul.f32 0.03125, %v1477_v22  ;;  %v1474_v24 = vpop.xlane.xlu1 %1473 }
 0xbf0   :  { %v1478_v25 = vmul.f32 0.03125, %v1474_v24 }
 0xbf1   :  { %v1481_v26 = vsub.f32 %v1471_v17, %v1479_v23 }
 0xbf2   :  { %v1480_v27 = vsub.f32 %v1470_v18, %v1478_v25 }
 0xbf3   :  { %v1483_v28 = vmul.f32 %v1481_v26, %v1481_v26 }
 0xbf4   :  { %v1482_v29 = vmul.f32 %v1480_v27, %v1480_v27 }
 0xbf5   :  { %v1487_v30 = vsel %vm168_vm7, %v1483_v28, 0.0 }
 0xbf6   :  { %1488 = vadd.xlane.f32.xlu1 %v1487_v30  ;;  %v1484_v31 = vsel %vm168_vm7, %v1482_v29, 0.0 }
 0xbf7   :  { %1485 = vadd.xlane.f32.xlu0 %v1484_v31 }
 0xc07   :  { %1504 = vrot.lane.b32.xlu1 %v2868_v13, %s3698_s2 }
 0xc0d   :  { %1499 = vrot.lane.b32.xlu0 %v2868_v13, %s3696_s0 }
 0xc83   :  { %v1489_v38 = vpop.xlane.xlu1 %1488 }
 0xc84   :  { %v1491_v40 = vmul.f32 0.03125, %v1489_v38  ;;  %v1486_v41 = vpop.xlane.xlu0 %1485 }
 0xc85   :  { %v1490_v43 = vmul.f32 0.03125, %v1486_v41 }
 0xc86   :  { %v1493_v44 = vadd.f32 1e-12, %v1491_v40 }
 0xc87   :  { %v1492_v45 = vadd.f32 1e-12, %v1490_v43  ;;  %v1505_v52 = vpop.permute.xlu1 %1504 }
 0xc88   :  { %3595 = vrsqrt.f32 %v1493_v44  ;;  %v1500_v47 = vpop.permute.xlu0 %1499 }
 0xc89   :  { %3597 = vrsqrt.f32 %v1492_v45 }
 0xc92   :  { %v3596_v46 = vpop.eup %3595 }
 0xc93   :  { %v3598_v48 = vpop.eup %3597  ;;  %v1497_v49 = vmul.f32 %v3596_v46, %v1481_v26 }
 0xc94   :  { %v1496_v50 = vmul.f32 %v3598_v48, %v1480_v27 }
 0xc95   :  { %v1503_v51 = vmul.f32 %v1500_v47, %v1497_v49 }
 0xc96   :  { %v1502_v53 = vmul.f32 %v1500_v47, %v1496_v50 }
 0xc97   :  { %v3922_v55 = vadd.f32 %v1505_v52, %v1503_v51 }
 0xc98   :  { %v3920_v54 = vadd.f32 %v1505_v52, %v1502_v53 }
 0xc9a   :  { %3172 = vmatprep.mubr.msk.f32.mxu1 %vm168_vm7, %v3920_v54 }
 0xc9b   :  { %3173 = vmatmul.mubr.msk.f32.vlgmr.msra.gmra.mrb[16].mxu1 %vm168_vm7, %v3922_v55 }
 0xd6e   :  { %v3174_v57 = vpop.f32.mrb[16].mxu1 }
 0xd6f   :  { %v1615_v58 = vadd.f32 %v3174_v57, %v2871_v56  ;;  %v1609_v59 = vpop.f32.mrb[17].mxu1 }
 0xd70   :  { %v1610_v60 = vadd.f32 %v2871_v56, %v1609_v59 }
 0xd72   :  { %3179 = vmatprep.mubr.msk.f32.mxu1 %vm317_vm8, %v1610_v60  ;;  %v3929_v61 = vpack.i.bf16 %v1615_v58, %v1610_v60 }
 0xd74   :  { %3516 = vrot.lane.b32.xlu0 %v3929_v61, %s3699_s30  ;;  %3511 = vrot.lane.b32.xlu1 %v3929_v61, %s3696_s0 }
 0xd78   :  { %3526 = vrot.lane.b32.xlu0 %v3929_v61, %s3701_s5  ;;  %3521 = vrot.lane.b32.xlu1 %v3929_v61, %s3700_s4 }
 0xd7c   :  { %1709 = vrot.lane.b32.xlu0 %v1615_v58, %s3702_s6  ;;  %1707 = vrot.lane.b32.xlu1 %v1610_v60, %s3702_s6 }
 0xd80   :  { %1800 = vrot.lane.b32.xlu0 %v1615_v58, %s3703_s7  ;;  %1798 = vrot.lane.b32.xlu1 %v1610_v60, %s3703_s7 }
 0xd84   :  { %1891 = vrot.lane.b32.xlu0 %v1615_v58, %s3704_s8  ;;  %1889 = vrot.lane.b32.xlu1 %v1610_v60, %s3704_s8 }
 0xde6   :  { %v3517_v62 = vpop.permute.xlu0 %3516  ;;  %v3512_v63 = vpop.permute.xlu1 %3511 }
 0xde7   :  { %v3519_v0 = vunpack.i.h.bf16 %v3517_v62  ;;  %v3518_v1 = vunpack.i.l.bf16 %v3517_v62  ;;  %v3514_v2 = vunpack.i.h.bf16 %v3512_v63  ;;  %v3513_v3 = vunpack.i.l.bf16 %v3512_v63 }
 0xde9   :  { %v3382_v4 = vpack.c.bf16 %v3519_v0, %v3518_v1  ;;  %v3376_v5 = vpack.c.bf16 %v3514_v2, %v3513_v3 }
 0xdea   :  { %v3527_v6 = vpop.permute.xlu0 %3526  ;;  %v3522_v15 = vpop.permute.xlu1 %3521 }
 0xdeb   :  { %v3529_v9 = vunpack.i.h.bf16 %v3527_v6  ;;  %v3528_v10 = vunpack.i.l.bf16 %v3527_v6  ;;  %v3524_v11 = vunpack.i.h.bf16 %v3522_v15  ;;  %v3523_v12 = vunpack.i.l.bf16 %v3522_v15  ;;  %3378 = vmatprep.subr.msk.bf16.mxu1 %vm3795_vm9, %v3376_v5  ;;  %3384 = vmatprep.subr.msk.bf16.mxu0 %vm3795_vm9, %v3382_v4 }
 0xdec   :  { %3381 = vmatpush3.bf16.xpose.msk.msra.mxu1 %vm3795_vm9, %v3376_v5  ;;  %3387 = vmatpush3.bf16.xpose.msk.msra.mxu0 %vm3795_vm9, %v3382_v4 }
 0xded   :  { %v3394_v13 = vpack.c.bf16 %v3529_v9, %v3528_v10  ;;  %v3388_v14 = vpack.c.bf16 %v3524_v11, %v3523_v12 }
 0xdee   :  { %v1708_v16 = vpop.permute.xlu1 %1707  ;;  %v1710_v8 = vpop.permute.xlu0 %1709 }
 0xdef   :  { %3186 = vmatprep.mubr.msk.f32.mxu0 %vm317_vm8, %v1708_v16  ;;  %3390 = vmatprep.subr.msk.bf16.mxu1 %vm3795_vm9, %v3388_v14 }
 0xdf0   :  { %3396 = vmatprep.subr.msk.bf16.mxu0 %vm3795_vm9, %v3394_v13 }
 0xdf2   :  { %v1799_v7 = vpop.permute.xlu1 %1798  ;;  %v1801_v17 = vpop.permute.xlu0 %1800 }
 0xdf3   :  { %3180 = vmatmul.mubr.msk.f32.vlgmr.msra.gmra.mrb[18].mxu1 %vm317_vm8, %v1615_v58  ;;  %3187 = vmatmul.mubr.msk.f32.vlgmr.msra.gmra.mrb[10].mxu0 %vm317_vm8, %v1710_v8 }
 0xdf4   :  { %3393 = vmatpush3.bf16.xpose.msk.msra.mxu1 %vm3795_vm9, %v3388_v14  ;;  %3193 = vmatprep.mubr.msk.f32.mxu1 %vm317_vm8, %v1799_v7 }
 0xdf5   :  { %3399 = vmatpush3.bf16.xpose.msk.msra.mxu0 %vm3795_vm9, %v3394_v13 }
 0xdf6   :  { %v1890_v18 = vpop.permute.xlu1 %1889  ;;  %v1892_v19 = vpop.permute.xlu0 %1891 }
 0xdf7   :  { %3200 = vmatprep.mubr.msk.f32.mxu0 %vm317_vm8, %v1890_v18 }
 0xdfb   :  { %3194 = vmatmul.mubr.msk.f32.vlgmr.msra.gmra.mrb[20].mxu1 %vm317_vm8, %v1801_v17 }
 0xdfc   :  { %3201 = vmatmul.mubr.msk.f32.vlgmr.msra.gmra.mrb[12].mxu0 %vm317_vm8, %v1892_v19 }
 0xec6   :  { %v3181_v20 = vpop.f32.mrb[18].mxu1  ;;  %v3188_v22 = vpop.f32.mrb[10].mxu0 }
 0xec7   :  { %v1981_v23 = vmul.f32 0.35355338, %v3181_v20  ;;  %v1698_v24 = vpop.f32.mrb[19].mxu1  ;;  %v1789_v25 = vpop.f32.mrb[11].mxu0  ;;  %v1983_v26 = vmul.f32 0.35355338, %v3188_v22 }
 0xec8   :  { %v1980_v27 = vmul.f32 0.35355338, %v1698_v24  ;;  %v1982_v28 = vmul.f32 0.35355338, %v1789_v25 }
 0xec9   :  { %v1989_v29 = vadd.f32 %v1981_v23, %v3825_v39  ;;  %v1991_v33 = vadd.f32 %v1983_v26, %v3825_v39 }
 0xeca   :  { %v1988_v21 = vadd.f32 %v1980_v27, %v3830_v42  ;;  %v1990_v31 = vadd.f32 %v1982_v28, %v3830_v42 }
 0xecb   :  { %v1999_v30 = vsel %vm690_vm10, %v1989_v29, -inf  ;;  %v2005_v44 = vsel %vm690_vm10, %v1991_v33, -inf }
 0xecc   :  { %2000 = vmax.xlane.f32.xlu0 %v1999_v30  ;;  %v1996_v32 = vsel %vm690_vm10, %v1988_v21, -inf  ;;  %v2002_v38 = vsel %vm690_vm10, %v1990_v31, -inf }
 0xecd   :  { %1997 = vmax.xlane.f32.xlu1 %v1996_v32 }
 0xece   :  { %v3195_v34 = vpop.f32.mrb[20].mxu1 }
 0xecf   :  { %v1985_v35 = vmul.f32 0.35355338, %v3195_v34  ;;  %v3202_v36 = vpop.f32.mrb[12].mxu0  ;;  %v1880_v37 = vpop.f32.mrb[21].mxu1 }
 0xed0   :  { %v1987_v40 = vmul.f32 0.35355338, %v3202_v36  ;;  %v1984_v41 = vmul.f32 0.35355338, %v1880_v37  ;;  %v1971_v43 = vpop.f32.mrb[13].mxu0  ;;  %2003 = vmax.xlane.f32.xlu0 %v2002_v38 }
 0xed1   :  { %v1986_v45 = vmul.f32 0.35355338, %v1971_v43  ;;  %2006 = vmax.xlane.f32.xlu1 %v2005_v44  ;;  %v1993_v46 = vadd.f32 %v1985_v35, %v3825_v39 }
 0xed2   :  { %v1992_v47 = vadd.f32 %v1984_v41, %v3830_v42  ;;  %v1995_v50 = vadd.f32 %v1987_v40, %v3825_v39 }
 0xed3   :  { %v2011_v48 = vsel %vm690_vm10, %v1993_v46, -inf  ;;  %v1994_v51 = vadd.f32 %v1986_v45, %v3830_v42 }
 0xed4   :  { %v2008_v49 = vsel %vm690_vm10, %v1992_v47, -inf  ;;  %v2017_v52 = vsel %vm690_vm10, %v1995_v50, -inf }
 0xed5   :  { %2012 = vmax.xlane.f32.xlu1 %v2011_v48  ;;  %2009 = vmax.xlane.f32.xlu0 %v2008_v49  ;;  %v2014_v53 = vsel %vm690_vm10, %v1994_v51, -inf }
 0xed9   :  { %2018 = vmax.xlane.f32.xlu1 %v2017_v52  ;;  %2015 = vmax.xlane.f32.xlu0 %v2014_v53 }
 0xeea   :  { %3536 = vrot.lane.b32.xlu1 %v3929_v61, %s3705_s1 }
 0xeef   :  { %3531 = vrot.lane.b32.xlu0 %v3929_v61, %s3698_s2 }
 0xf59   :  { %v2001_v56 = vpop.xlane.xlu0 %2000 }
 0xf5a   :  { %v2021_v57 = vsub.f32 %v1989_v29, %v2001_v56  ;;  %v1998_v58 = vpop.xlane.xlu1 %1997 }
 0xf5b   :  { %v2020_v39 = vsub.f32 %v1988_v21, %v1998_v58 }
 0xf5c   :  { %v2030_v59 = vmul.f32 1.442695, %v2021_v57 }
 0xf5d   :  { %v2028_v42 = vmul.f32 1.442695, %v2020_v39  ;;  %v2004_v60 = vpop.xlane.xlu0 %2003 }
 0xf5e   :  { %3599 = vpow2.f32 %v2030_v59  ;;  %v2022_v62 = vsub.f32 %v1990_v31, %v2004_v60  ;;  %v2007_v63 = vpop.xlane.xlu1 %2006 }
 0xf5f   :  { %3601 = vpow2.f32 %v2028_v42  ;;  %v2023_v0 = vsub.f32 %v1991_v33, %v2007_v63 }
 0xf60   :  { %v2032_v1 = vmul.f32 1.442695, %v2022_v62 }
 0xf61   :  { %v2034_v2 = vmul.f32 1.442695, %v2023_v0 }
 0xf62   :  { %3603 = vpow2.f32 %v2032_v1  ;;  %v2013_v3 = vpop.xlane.xlu1 %2012  ;;  %v2010_v4 = vpop.xlane.xlu0 %2009 }
 0xf63   :  { %3605 = vpow2.f32 %v2034_v2  ;;  %v2025_v5 = vsub.f32 %v1993_v46, %v2013_v3  ;;  %v2024_v6 = vsub.f32 %v1992_v47, %v2010_v4 }
 0xf65   :  { %v2038_v15 = vmul.f32 1.442695, %v2025_v5  ;;  %v2036_v9 = vmul.f32 1.442695, %v2024_v6 }
 0xf66   :  { %v2019_v10 = vpop.xlane.xlu1 %2018  ;;  %v2016_v11 = vpop.xlane.xlu0 %2015 }
 0xf67   :  { %3607 = vpow2.f32 %v2038_v15  ;;  %v2027_v12 = vsub.f32 %v1995_v50, %v2019_v10  ;;  %v2026_v13 = vsub.f32 %v1994_v51, %v2016_v11  ;;  %v1513_v10 = vld [vmem:[#allocation2 + $0x110] sm:$0xff]  ;;  %v1514_v11 = vld [vmem:[#allocation2 + $0x118] sm:$0xff] }
 0xf68   :  { %v3600_v14 = vpop.eup %3599  ;;  %3609 = vpow2.f32 %v2036_v9 }
 0xf69   :  { %v3602_v16 = vpop.eup %3601  ;;  %v2042_v8 = vmul.f32 1.442695, %v2027_v12  ;;  %v2040_v7 = vmul.f32 1.442695, %v2026_v13  ;;  %v2047_v17 = vsel %vm690_vm10, %v3600_v14, 0.0  ;;  %v3416_v12 = vpack.c.bf16 %v1514_v11, %v1513_v10  ;;  %v1515_v13 = vld [vmem:[#allocation2 + $0x120] sm:$0xff] }
 0xf6a   :  { %2048 = vadd.xlane.f32.xlu1 %v2047_v17  ;;  %v3537_v18 = vpop.permute.xlu1 %3536  ;;  %v3532_v19 = vpop.permute.xlu0 %3531  ;;  %v2044_v20 = vsel %vm690_vm10, %v3602_v16, 0.0 }
 0xf6b   :  { %3611 = vpow2.f32 %v2042_v8  ;;  %v3534_v22 = vunpack.i.h.bf16 %v3532_v19  ;;  %2045 = vadd.xlane.f32.xlu0 %v2044_v20  ;;  %v3539_v24 = vunpack.i.h.bf16 %v3537_v18  ;;  %v3538_v25 = vunpack.i.l.bf16 %v3537_v18 }
 0xf6c   :  { %v3604_v23 = vpop.eup %3603  ;;  %3613 = vpow2.f32 %v2040_v7  ;;  %v3533_v26 = vunpack.i.l.bf16 %v3532_v19 }
 0xf6d   :  { %v3606_v27 = vpop.eup %3605  ;;  %v2050_v28 = vsel %vm690_vm10, %v3604_v23, 0.0  ;;  %v3404_v30 = vpack.c.bf16 %v3539_v24, %v3538_v25 }
 0xf6e   :  { %v3400_v29 = vpack.c.bf16 %v3534_v22, %v3533_v26  ;;  %v2053_v21 = vsel %vm690_vm10, %v3606_v27, 0.0 }
 0xf6f   :  { %2054 = vadd.xlane.f32.xlu1 %v2053_v21  ;;  %2051 = vadd.xlane.f32.xlu0 %v2050_v28 }
 0xf70   :  { %3401 = vmatprep.subr.bf16.mxu1 %v3400_v29 }
 0xf71   :  { %v3608_v31 = vpop.eup %3607  ;;  %3403 = vmatpush3.bf16.msra.mxu1 %v3400_v29 }
 0xf72   :  { %v3610_v32 = vpop.eup %3609  ;;  %3405 = vmatprep.subr.bf16.mxu1 %v3404_v30  ;;  %v2059_v33 = vsel %vm690_vm10, %v3608_v31, 0.0 }
 0xf73   :  { %2060 = vadd.xlane.f32.xlu1 %v2059_v33  ;;  %v2056_v34 = vsel %vm690_vm10, %v3610_v32, 0.0 }
 0xf74   :  { %2057 = vadd.xlane.f32.xlu0 %v2056_v34 }
 0xf75   :  { %v3612_v35 = vpop.eup %3611 }
 0xf76   :  { %v3614_v36 = vpop.eup %3613  ;;  %v2065_v37 = vsel %vm690_vm10, %v3612_v35, 0.0 }
 0xf77   :  { %2066 = vadd.xlane.f32.xlu1 %v2065_v37  ;;  %v2062_v38 = vsel %vm690_vm10, %v3614_v36, 0.0 }
 0xf78   :  { %2063 = vadd.xlane.f32.xlu0 %v2062_v38 }
 0xf88   :  { %3541 = vrot.lane.b32.xlu1 %v3929_v61, %s3706_s13 }
 0xf8e   :  { %3546 = vrot.lane.b32.xlu0 %v3929_v61, %s3707_s14 }
 0xff7   :  { %v2049_v40 = vpop.xlane.xlu1 %2048 }
 0xff8   :  { %3615 = vrcp.f32 %v2049_v40  ;;  %v2046_v41 = vpop.xlane.xlu0 %2045 }
 0xff9   :  { %3617 = vrcp.f32 %v2046_v41 }
 0xffc   :  { %v2055_v43 = vpop.xlane.xlu1 %2054  ;;  %v2052_v44 = vpop.xlane.xlu0 %2051 }
 0xffd   :  { %3619 = vrcp.f32 %v2055_v43 }
 0xffe   :  { %3621 = vrcp.f32 %v2052_v44 }
0x1000   :  { %v2061_v45 = vpop.xlane.xlu1 %2060 }
0x1001   :  { %3623 = vrcp.f32 %v2061_v45  ;;  %v2058_v46 = vpop.xlane.xlu0 %2057 }
0x1002   :  { %v3616_v47 = vpop.eup %3615  ;;  %3625 = vrcp.f32 %v2058_v46 }
0x1003   :  { %v3618_v48 = vpop.eup %3617  ;;  %v2071_v51 = vmul.f32 %v3616_v47, %v3600_v14  ;;  %v1516_v14 = vld [vmem:[#allocation2 + $0x128] sm:$0xff] }
0x1004   :  { %v2067_v49 = vpop.xlane.xlu1 %2066  ;;  %v2069_v50 = vmul.f32 %v3618_v48, %v3602_v16  ;;  %v3420_v8 = vpack.c.bf16 %v1516_v14, %v1515_v13  ;;  %v1521_v13 = vld [vmem:[#allocation2 + $0x150] sm:$0xff]  ;;  %v1522_v14 = vld [vmem:[#allocation2 + $0x158] sm:$0xff] }
0x1005   :  { %3627 = vrcp.f32 %v2067_v49  ;;  %v2064_v52 = vpop.xlane.xlu0 %2063 }
0x1006   :  { %3629 = vrcp.f32 %v2064_v52  ;;  %3207 = vmatprep.mubr.msk.f32.mxu1 %vm690_vm10, %v2069_v50 }
0x1007   :  { %v3620_v61 = vpop.eup %3619  ;;  %3208 = vmatmul.mubr.msk.f32.vlgmr.msra.gmra.mrb[22].mxu1 %vm690_vm10, %v2071_v51 }
0x1008   :  { %v3622_v53 = vpop.eup %3621  ;;  %v2075_v56 = vmul.f32 %v3620_v61, %v3606_v27  ;;  %3407 = vmatpush3.bf16.msra.mxu1 %v3404_v30  ;;  %v3542_v57 = vpop.permute.xlu1 %3541 }
0x1009   :  { %v3544_v58 = vunpack.i.h.bf16 %v3542_v57  ;;  %v3543_v39 = vunpack.i.l.bf16 %v3542_v57  ;;  %v3547_v59 = vpop.permute.xlu0 %3546  ;;  %v2073_v42 = vmul.f32 %v3622_v53, %v3604_v23 }
0x100a   :  { %v3549_v60 = vunpack.i.h.bf16 %v3547_v59  ;;  %v3548_v62 = vunpack.i.l.bf16 %v3547_v59 }
0x100b   :  { %v3624_v63 = vpop.eup %3623  ;;  %v3408_v0 = vpack.c.bf16 %v3544_v58, %v3543_v39  ;;  %3214 = vmatprep.mubr.msk.f32.mxu1 %vm690_vm10, %v2073_v42  ;;  %v1519_v58 = vld [vmem:[#allocation2 + $0x140] sm:$0xff]  ;;  %v1520_v39 = vld [vmem:[#allocation2 + $0x148] sm:$0xff] }
0x100c   :  { %v3626_v1 = vpop.eup %3625  ;;  %v3412_v2 = vpack.c.bf16 %v3549_v60, %v3548_v62  ;;  %3215 = vmatmul.mubr.msk.f32.vlgmr.msra.gmra.mrb[24].mxu1 %vm690_vm10, %v2075_v56  ;;  %v2079_v5 = vmul.f32 %v3624_v63, %v3608_v31  ;;  %v1518_v56 = vld [vmem:[#allocation2 + $0x138] sm:$0xff]  ;;  %v3428_v59 = vpack.c.bf16 %v1520_v39, %v1519_v58 }
0x100d   :  { %3409 = vmatprep.subr.bf16.mxu0 %v3408_v0  ;;  %v2077_v3 = vmul.f32 %v3626_v1, %v3610_v32 }
0x100e   :  { %3413 = vmatprep.subr.bf16.mxu1 %v3412_v2  ;;  %3411 = vmatpush3.bf16.msra.mxu0 %v3408_v0 }
0x100f   :  { %v3628_v4 = vpop.eup %3627  ;;  %3221 = vmatprep.mubr.msk.f32.mxu0 %vm690_vm10, %v2077_v3  ;;  %3415 = vmatpush3.bf16.msra.mxu1 %v3412_v2 }
0x1010   :  { %v3630_v6 = vpop.eup %3629  ;;  %v2083_v15 = vmul.f32 %v3628_v4, %v3612_v35  ;;  %3417 = vmatprep.subr.bf16.mxu0 %v3416_v12  ;;  %v2898_v35 = vld [vmem:[#allocation2 + $0x196] ss:$0 sm:$0xff] }
0x1011   :  { %3222 = vmatmul.mubr.msk.f32.vlgmr.msra.gmra.mrb[14].mxu0 %vm690_vm10, %v2079_v5  ;;  %v2081_v9 = vmul.f32 %v3630_v6, %v3614_v36 }
0x1012   :  { %3419 = vmatpush3.bf16.msra.mxu0 %v3416_v12 }
0x1013   :  { %3228 = vmatprep.mubr.msk.f32.mxu1 %vm690_vm10, %v2081_v9  ;;  %3421 = vmatprep.subr.bf16.mxu0 %v3420_v8 }
0x1014   :  { %3229 = vmatmul.mubr.msk.f32.vlgmr.msra.gmra.mrb[26].mxu1 %vm690_vm10, %v2083_v15 }
0x1016   :  { %3423 = vmatpush3.bf16.msra.mxu0 %v3420_v8  ;;  %v1523_v8 = vld [vmem:[#allocation2 + $0x160] sm:$0xff] }
0x10da   :  { %v3209_v16 = vpop.f32.mrb[22].mxu1 }
0x10db   :  { %v2162_v7 = vpop.f32.mrb[23].mxu1 }
0x10df   :  { %v3216_v17 = vpop.f32.mrb[24].mxu1 }
0x10e0   :  { %2436 = vrot.lane.b32.xlu0 %v3216_v17, %s3693_s23  ;;  %v2249_v18 = vpop.f32.mrb[25].mxu1 }
0x10e1   :  { %2434 = vrot.lane.b32.xlu1 %v2249_v18, %s3693_s23  ;;  %v1525_v18 = vld [vmem:[#allocation2 + $0x170] sm:$0xff] }
0x10e4   :  { %v3223_v19 = vpop.f32.mrb[14].mxu0 }
0x10e5   :  { %v2336_v20 = vpop.f32.mrb[15].mxu0  ;;  %2444 = vrot.lane.b32.xlu0 %v3223_v19, %s3708_s15  ;;  %v1526_v19 = vld [vmem:[#allocation2 + $0x178] sm:$0xff] }
0x10e6   :  { %2442 = vrot.lane.b32.xlu1 %v2336_v20, %s3708_s15  ;;  %v3440_v20 = vpack.c.bf16 %v1526_v19, %v1525_v18 }
0x10e7   :  { %v3230_v22 = vpop.f32.mrb[26].mxu1 }
0x10e8   :  { %v2423_v23 = vpop.f32.mrb[27].mxu1 }
0x10e9   :  { %2452 = vrot.lane.b32.xlu0 %v3230_v22, %s3709_s16  ;;  %v1527_v22 = vld [vmem:[#allocation2 + $0x180] sm:$0xff] }
0x10ea   :  { %2450 = vrot.lane.b32.xlu1 %v2423_v23, %s3709_s16  ;;  %v1528_v23 = vld [vmem:[#allocation2 + $0x188] sm:$0xff] }
0x1152   :  { %v2437_v24 = vpop.permute.xlu0 %2436 }
0x1153   :  { %v2435_v25 = vpop.permute.xlu1 %2434  ;;  %v2457_v21 = vsel %vm317_vm8, %v3209_v16, %v2437_v24  ;;  %v3432_v16 = vpack.c.bf16 %v1522_v14, %v1521_v13  ;;  %v3444_v24 = vpack.c.bf16 %v1528_v23, %v1527_v22 }
0x1154   :  { %v2456_v28 = vsel %vm317_vm8, %v2162_v7, %v2435_v25  ;;  %v1524_v7 = vld [vmem:[#allocation2 + $0x168] sm:$0xff]  ;;  %v2901_v25 = vld [vmem:[#allocation2 + $0x197] ss:$0 sm:$0xff] }
0x1155   :  { %v3436_v17 = vpack.c.bf16 %v1524_v7, %v1523_v8  ;;  %3433 = vmatprep.subr.bf16.mxu0 %v3432_v16 }
0x1157   :  { %v2445_v26 = vpop.permute.xlu0 %2444 }
0x1158   :  { %v2443_v27 = vpop.permute.xlu1 %2442  ;;  %v2459_v32 = vsel %vm690_vm10, %v2457_v21, %v2445_v26 }
0x1159   :  { %v2458_v30 = vsel %vm690_vm10, %v2456_v28, %v2443_v27 }
0x115b   :  { %v2453_v29 = vpop.permute.xlu0 %2452 }
0x115c   :  { %v2451_v31 = vpop.permute.xlu1 %2450  ;;  %v2461_v34 = vsel %vm1155_vm11, %v2459_v32, %v2453_v29 }
0x115d   :  { %v2460_v33 = vsel %vm1155_vm11, %v2458_v30, %v2451_v31 }
0x115e   :  { %3239 = vmatprep.mubr.msk.f32.mxu0 %vm168_vm7, %v2460_v33 }
0x115f   :  { %3240 = vmatmul.mubr.msk.f32.vlgmr.msra.gmra.mrb[16].mxu0 %vm168_vm7, %v2461_v34 }
0x1160   :  { %3435 = vmatpush3.bf16.msra.mxu0 %v3432_v16 }
0x1161   :  { %3437 = vmatprep.subr.bf16.mxu0 %v3436_v17 }
0x1164   :  { %3439 = vmatpush3.bf16.msra.mxu0 %v3436_v17 }
0x1165   :  { %3441 = vmatprep.subr.bf16.mxu0 %v3440_v20 }
0x1168   :  { %3443 = vmatpush3.bf16.msra.mxu0 %v3440_v20 }
0x1169   :  { %3445 = vmatprep.subr.bf16.mxu0 %v3444_v24 }
0x116c   :  { %3447 = vmatpush3.bf16.msra.mxu0 %v3444_v24 }
0x1232   :  { %v3241_v36 = vpop.f32.mrb[16].mxu0 }
0x1233   :  { %v2544_v37 = vadd.f32 %v3241_v36, %v2898_v35  ;;  %v2538_v38 = vpop.f32.mrb[17].mxu0 }
0x1234   :  { %v2539_v40 = vadd.f32 %v2898_v35, %v2538_v38 }
0x1235   :  { %v2548_v41 = vadd.f32 %v2544_v37, %v3922_v55 }
0x1236   :  { %v2547_v43 = vadd.f32 %v2539_v40, %v3920_v54  ;;  %v1517_v54 = vld [vmem:[#allocation2 + $0x130] sm:$0xff] }
0x1237   :  { %v2552_v44 = vsel %vm168_vm7, %v2548_v41, 0.0  ;;  %v3424_v57 = vpack.c.bf16 %v1518_v56, %v1517_v54 }
0x1238   :  { %2553 = vadd.xlane.f32.xlu0 %v2552_v44  ;;  %v2549_v45 = vsel %vm168_vm7, %v2547_v43, 0.0 }
0x1239   :  { %2550 = vadd.xlane.f32.xlu1 %v2549_v45  ;;  %3425 = vmatprep.subr.bf16.mxu1 %v3424_v57 }
0x123a   :  { %3427 = vmatpush3.bf16.msra.mxu1 %v3424_v57 }
0x123b   :  { %3429 = vmatprep.subr.bf16.mxu1 %v3428_v59 }
0x123e   :  { %3431 = vmatpush3.bf16.msra.mxu1 %v3428_v59 }
0x12c5   :  { %v2554_v46 = vpop.xlane.xlu0 %2553 }
0x12c6   :  { %v2556_v47 = vmul.f32 0.03125, %v2554_v46  ;;  %v2551_v48 = vpop.xlane.xlu1 %2550 }
0x12c7   :  { %v2555_v49 = vmul.f32 0.03125, %v2551_v48 }
0x12c8   :  { %v2558_v50 = vsub.f32 %v2548_v41, %v2556_v47 }
0x12c9   :  { %v2557_v51 = vsub.f32 %v2547_v43, %v2555_v49  ;;  %v2904_v49 = vld [vmem:[#allocation2 + $0x198] ss:$0 sm:$0xff] }
0x12ca   :  { %v2560_v52 = vmul.f32 %v2558_v50, %v2558_v50 }
0x12cb   :  { %v2559_v61 = vmul.f32 %v2557_v51, %v2557_v51 }
0x12cc   :  { %v2564_v53 = vsel %vm168_vm7, %v2560_v52, 0.0 }
0x12cd   :  { %2565 = vadd.xlane.f32.xlu1 %v2564_v53  ;;  %v2561_v55 = vsel %vm168_vm7, %v2559_v61, 0.0 }
0x12ce   :  { %2562 = vadd.xlane.f32.xlu0 %v2561_v55 }
0x12de   :  { %2581 = vrot.lane.b32.xlu1 %v2898_v35, %s3698_s2 }
0x12e4   :  { %2576 = vrot.lane.b32.xlu0 %v2898_v35, %s3696_s0 }
0x135a   :  { %v2566_v42 = vpop.xlane.xlu1 %2565 }
0x135b   :  { %v2568_v60 = vmul.f32 0.03125, %v2566_v42  ;;  %v2563_v62 = vpop.xlane.xlu0 %2562 }
0x135c   :  { %v2567_v63 = vmul.f32 0.03125, %v2563_v62 }
0x135d   :  { %v2570_v0 = vadd.f32 1e-12, %v2568_v60 }
0x135e   :  { %v2569_v1 = vadd.f32 1e-12, %v2567_v63  ;;  %v2582_v9 = vpop.permute.xlu1 %2581 }
0x135f   :  { %3631 = vrsqrt.f32 %v2570_v0  ;;  %v2577_v3 = vpop.permute.xlu0 %2576 }
0x1360   :  { %3633 = vrsqrt.f32 %v2569_v1 }
0x1369   :  { %v3632_v2 = vpop.eup %3631 }
0x136a   :  { %v3634_v4 = vpop.eup %3633  ;;  %v2574_v5 = vmul.f32 %v3632_v2, %v2558_v50 }
0x136b   :  { %v2573_v6 = vmul.f32 %v3634_v4, %v2557_v51 }
0x136c   :  { %v2580_v15 = vmul.f32 %v2577_v3, %v2574_v5 }
0x136d   :  { %v2579_v10 = vmul.f32 %v2577_v3, %v2573_v6 }
0x136e   :  { %v2585_v12 = vadd.f32 %v2582_v9, %v2580_v15 }
0x136f   :  { %v2584_v11 = vadd.f32 %v2582_v9, %v2579_v10 }
0x1371   :  { %3250 = vmatprep.mubr.msk.f32.mxu1 %vm168_vm7, %v2584_v11 }
0x1372   :  { %3251 = vmatmul.mubr.msk.f32.vlgmr.msra.gmra.mrb[28].mxu1 %vm168_vm7, %v2585_v12 }
0x1445   :  { %v3252_v26 = vpop.f32.mrb[28].mxu1 }
0x1446   :  { %v2668_v27 = vadd.f32 %v3252_v26, %v2901_v25  ;;  %v2662_v28 = vpop.f32.mrb[29].mxu1 }
0x1447   :  { %v2663_v29 = vadd.f32 %v2901_v25, %v2662_v28 }
0x1448   :  { %v2674_v21 = vmul.f32 0.044715, %v2668_v27  ;;  %v2672_v46 = vmul.f32 0.5, %v2668_v27 }
0x1449   :  { %v2673_v30 = vmul.f32 0.044715, %v2663_v29  ;;  %v2671_v44 = vmul.f32 0.5, %v2663_v29 }
0x144a   :  { %v2676_v31 = vmul.f32 %v2674_v21, %v2668_v27 }
0x144b   :  { %v2675_v32 = vmul.f32 %v2673_v30, %v2663_v29 }
0x144c   :  { %v2678_v33 = vmul.f32 %v2676_v31, %v2668_v27 }
0x144d   :  { %v2677_v34 = vmul.f32 %v2675_v32, %v2663_v29 }
0x144e   :  { %v2680_v35 = vadd.f32 %v2678_v33, %v2668_v27 }
0x144f   :  { %v2679_v36 = vadd.f32 %v2677_v34, %v2663_v29 }
0x1450   :  { %v2682_v37 = vmul.f32 0.7978846, %v2680_v35 }
0x1451   :  { %v2681_v38 = vmul.f32 0.7978846, %v2679_v36 }
0x1452   :  { %3635 = vtanh.f32 %v2682_v37 }
0x1453   :  { %3637 = vtanh.f32 %v2681_v38 }
0x145c   :  { %v3636_v40 = vpop.eup %3635 }
0x145d   :  { %v3638_v41 = vpop.eup %3637  ;;  %v2686_v43 = vadd.f32 1.0, %v3636_v40 }
0x145e   :  { %v2685_v45 = vadd.f32 1.0, %v3638_v41 }
0x145f   :  { %v2688_v48 = vmul.f32 %v2686_v43, %v2672_v46 }
0x1460   :  { %v2687_v47 = vmul.f32 %v2685_v45, %v2671_v44 }
0x1462   :  { %3269 = vmatprep.mubr.msk.f32.mxu0 %vm76_vm2, %v2687_v47 }
0x1463   :  { %3270 = vmatmul.mubr.msk.f32.vlgmr.msra.gmra.mrb[18].mxu0 %vm76_vm2, %v2688_v48 }
0x1536   :  { %v3271_v50 = vpop.f32.mrb[18].mxu0 }
0x1537   :  { %v2771_v51 = vadd.f32 %v3271_v50, %v2904_v49  ;;  %v2765_v52 = vpop.f32.mrb[19].mxu0 }
0x1538   :  { %v2766_v61 = vadd.f32 %v2904_v49, %v2765_v52 }
0x1539   :  { %v2775_v53 = vadd.f32 %v2771_v51, %v2585_v12 }
0x153a   :  { %v2774_v55 = vadd.f32 %v2766_v61, %v2584_v11 }
0x153b   :  { %v2779_v54 = vsel %vm168_vm7, %v2775_v53, 0.0 }
0x153c   :  { %2780 = vadd.xlane.f32.xlu0 %v2779_v54  ;;  %v2776_v56 = vsel %vm168_vm7, %v2774_v55, 0.0 }
0x153d   :  { %2777 = vadd.xlane.f32.xlu1 %v2776_v56 }
0x15c9   :  { %v2781_v57 = vpop.xlane.xlu0 %2780 }
0x15ca   :  { %v2783_v58 = vmul.f32 0.03125, %v2781_v57  ;;  %v2778_v39 = vpop.xlane.xlu1 %2777 }
0x15cb   :  { %v2782_v59 = vmul.f32 0.03125, %v2778_v39 }
0x15cc   :  { %v2785_v42 = vsub.f32 %v2775_v53, %v2783_v58 }
0x15cd   :  { %v2784_v60 = vsub.f32 %v2774_v55, %v2782_v59 }
0x15ce   :  { %v2787_v62 = vmul.f32 %v2785_v42, %v2785_v42 }
0x15cf   :  { %v2786_v63 = vmul.f32 %v2784_v60, %v2784_v60 }
0x15d0   :  { %v2791_v0 = vsel %vm168_vm7, %v2787_v62, 0.0 }
0x15d1   :  { %2792 = vadd.xlane.f32.xlu1 %v2791_v0  ;;  %v2788_v1 = vsel %vm168_vm7, %v2786_v63, 0.0 }
0x15d2   :  { %2789 = vadd.xlane.f32.xlu0 %v2788_v1 }
0x15e2   :  { %2808 = vrot.lane.b32.xlu1 %v2904_v49, %s3698_s2 }
0x15e8   :  { %2803 = vrot.lane.b32.xlu0 %v2904_v49, %s3696_s0 }
0x165e   :  { %v2793_v2 = vpop.xlane.xlu1 %2792 }
0x165f   :  { %v2795_v3 = vmul.f32 0.03125, %v2793_v2  ;;  %v2790_v4 = vpop.xlane.xlu0 %2789 }
0x1660   :  { %v2794_v5 = vmul.f32 0.03125, %v2790_v4 }
0x1661   :  { %v2797_v6 = vadd.f32 1e-12, %v2795_v3 }
0x1662   :  { %v2796_v15 = vadd.f32 1e-12, %v2794_v5  ;;  %v2809_v14 = vpop.permute.xlu1 %2808 }
0x1663   :  { %3639 = vrsqrt.f32 %v2797_v6  ;;  %v2804_v10 = vpop.permute.xlu0 %2803 }
0x1664   :  { %3641 = vrsqrt.f32 %v2796_v15 }
0x166d   :  { %v3640_v9 = vpop.eup %3639 }
0x166e   :  { %v3642_v11 = vpop.eup %3641  ;;  %v2801_v12 = vmul.f32 %v3640_v9, %v2785_v42 }
0x166f   :  { %v2800_v13 = vmul.f32 %v3642_v11, %v2784_v60 }
0x1670   :  { %v2807_v16 = vmul.f32 %v2804_v10, %v2801_v12 }
0x1671   :  { %v2806_v8 = vmul.f32 %v2804_v10, %v2800_v13 }
0x1672   :  { %v2812_v7 = vadd.f32 %v2809_v14, %v2807_v16 }
0x1673   :  { %v2811_v17 = vadd.f32 %v2809_v14, %v2806_v8 }
0x1674   :  { %2814 = vst.msk [vmem:[#allocation5 + $0x8] sm:$0xff] %vm168_vm7, %v2812_v7 }
0x1675   :  { %2813 = vst.msk [vmem:[#allocation5] sm:$0xff] %vm168_vm7, %v2811_v17 }
0x1676   :  { %3676 = shalt.err (!%p3673_p12)
}
0x1677   :  { %s3677_s24 = scalar_lea.hbm %s4060_s3, 256 }
0x1678   :  { %p3678_p13 = scmp.ne.s32.totalorder %s4060_s3, %s3677_s24  ;;  %p3681_p0 = scmp.lt.u32.totalorder %s3677_s24, %s4060_s3 }
0x167a   :  { %p3683_p1 = pnand %p3681_p0, %p3678_p13 }
0x167c   :  { %3686 = shalt.err (!%p3683_p1)
}
0x167d   :  { %2826 = dma.vmem_to_hbm [thread:$0]  %s2821_s18, 256, %s4060_s3, [#allocation4], %s3692_s22, %s3692_s22, %s3693_s23  }
0x167e   :  { %3689 = dma.done.wait [#allocation4], 256  }
0x167f   :  { %3690 = vsyncadd [#allocation4], 4294967040 }
0x1680   :  { %2830 = vsyncpa [#allocation3], 1 }
0x1681   :  { %2831 = vsyncpa [#allocation4], 1 }

</bundles_post_ra>
